<compile_context>
chip_gen: v6e
topology: v6e:2x2x1
jax: 0.10.0
libtpu: 0.0.40
codegen_flags: <defaults>
</compile_context>

<pallas_src>
import functools

import numpy as np
import jax
import jax.numpy as jnp
from jax import lax
from jax.experimental import pallas as pl
from jax.experimental.pallas import tpu as pltpu

# ----------------------------- static problem constants -----------------------------
NX = NY = 13
N_NODES = NX * NY                                     # 169
INTF_NODES = (0, NX - 1, NX * NY - 1, NX * NY - NX)   # (0, 12, 168, 156)
HEATER_NODES = (
    int((NX - 1) / 4 + (NX - 1) / 2 * NX),            # 81
    int((NX - 1) / 2 + (NX - 1) / 4 * NX),            # 45
    int((NX - 1) / 4 + 3 * (NX - 1) / 4 * NX),        # 120
    int(3 * (NX - 1) / 4 + 3 * (NX - 1) / 4 * NX),    # 126
)

L = 0.1
THICKNESS = 0.001
BOARD_K = 15.0
IR_EMISS = 0.8
RHO = 2700.0
CP = 900.0
DT = 1.0
DX = DY = L / (NX - 1)
GLX = THICKNESS * BOARD_K * DY / DX
GLY = THICKNESS * BOARD_K * DX / DY
GR = 2.0 * DX * DY * IR_EMISS
SIGMA = 5.67e-08
VOL_HEAT = RHO * CP * THICKNESS * DX * DY
VOLHEAT_DT = VOL_HEAT / DT

LAMBDA_REC = 1.0
LAMBDA_PHYS = 1.0
LAMBDA_BDRY = 1.0

# PyTorch's TotalLoss requires a user-supplied denormalize_output_fn; we use a
# fixed deterministic affine map (temperature-like), same in kernel & reference.
DEN_SCALE = 40.0
DEN_SHIFT = 300.0

HEATER_IDX = np.asarray(HEATER_NODES, np.int32)
INTF_IDX = np.asarray(INTF_NODES, np.int32)


@functools.lru_cache(maxsize=None)
def build_K_E():
    """Dense K / diag(E), matching PhysicsLossTransient.__init__ (host, cached)."""
    K = np.zeros((N_NODES, N_NODES), np.float32)
    intf = set(INTF_NODES)
    for j in range(NY):
        for i in range(NX):
            idx = i + NX * j
            if idx in intf:
                K[idx, idx] = 1.0
            else:
                diag = 0.0
                if i + 1 < NX:
                    K[idx, idx + 1] += -GLX
                    diag += GLX
                if i - 1 >= 0:
                    K[idx, idx - 1] += -GLX
                    diag += GLX
                if j + 1 < NY:
                    K[idx, idx + NX] += -GLY
                    diag += GLY
                if j - 1 >= 0:
                    K[idx, idx - NX] += -GLY
                    diag += GLY
                K[idx, idx] += diag
    e = np.zeros((N_NODES,), np.float32)
    for idx in range(N_NODES):
        if idx not in intf:
            e[idx] = GR
    return K, e


@functools.lru_cache(maxsize=None)
def _static_constants():
    """Host-built kernel constants (computed once per process)."""
    K, e = build_K_E()
    kt = np.ascontiguousarray(K.T)                               # [N, N]
    es = (SIGMA * e).reshape(1, N_NODES).astype(np.float32)      # sigma * diag(E)
    mask = np.zeros((1, N_NODES), np.float32)
    mask[0, INTF_IDX] = 1.0
    return kt, es, mask


# ----------------------------------- Pallas kernel -----------------------------------
def _total_loss_kernel(kt_ref, es_ref, mask_ref, c_ref, gtgt_ref, yh_ref, y_ref,
                       out_ref, phys_acc, rec_acc, bdry_acc, *, num_batches):
    b = pl.program_id(0)
    T, N = yh_ref.shape                      # per-batch block: (T, N)

    @pl.when(b == 0)
    def _():
        phys_acc[...] = jnp.zeros_like(phys_acc)
        rec_acc[...] = jnp.zeros_like(rec_acc)
        bdry_acc[...] = jnp.zeros_like(bdry_acc)

    yh = yh_ref[...]                         # normalized predictions, this batch
    y = y_ref[...]                           # normalized targets,     this batch

    # -------- reconstruction MSE (normalized): accumulate sum of squares --------
    d = yh - y
    rec_acc[...] += jnp.sum(d * d)

    # -------- denormalize once per block --------
    yh_d = yh * DEN_SCALE + DEN_SHIFT        # [T, N]
    y_d = y * DEN_SCALE + DEN_SHIFT          # [T, N]

    # -------- boundary loss: masked squared error on the 4 interface nodes --------
    bd = yh_d - gtgt_ref[...]                # (1, N) broadcast over (T, N)
    bdry_acc[...] += jnp.sum(bd * bd * mask_ref[...])

    # -------- transient physics residual: all T-1 steps of this batch at once --------
    #   resid = vol_heat/dt*(T_new - T_old) - [Q - K T_old - sigma E (T_old^4 - Tenv^4)]
    T_old = y_d[: T - 1, :]                  # truth  t = 0 .. T-2
    T_new = yh_d[1:, :]                      # pred   t = 1 .. T-1
    kt_term = jnp.dot(T_old, kt_ref[...],
                      preferred_element_type=jnp.float32,
                      precision=lax.Precision.HIGHEST)           # == (K @ T_old^T)^T
    t2 = T_old * T_old
    rad = es_ref[...] * (t2 * t2)                                # sigma*E*T_old^4
    resid = VOLHEAT_DT * (T_new - T_old) - (c_ref[...] - kt_term - rad)
    # lane reduction first (XLU), then accumulate the (T-1, 1) column over batches
    phys_acc[...] += jnp.sum(jnp.abs(resid), axis=-1, keepdims=True)

    # -------- finalize & pack the four scalars lane-dense on the last batch --------
    @pl.when(b == num_batches - 1)
    def _():
        loss_rec = jnp.sum(rec_acc[...]) * (1.0 / (num_batches * T * N))
        loss_bdry = jnp.sum(bdry_acc[...]) * (1.0 / (num_batches * T * 4))
        loss_t = phys_acc[...] * (1.0 / (num_batches * N))       # (T-1, 1)
        loss_phys = jnp.sum(loss_t * loss_t) * (1.0 / (T - 1))
        total = (LAMBDA_REC * loss_rec
                 + LAMBDA_PHYS * loss_phys
                 + LAMBDA_BDRY * loss_bdry)
        lane = lax.broadcasted_iota(jnp.int32, (1, 128), 1)
        out_ref[...] = jnp.where(
            lane == 0, total,
            jnp.where(lane == 1, loss_rec,
                      jnp.where(lane == 2, loss_phys,
                                jnp.where(lane == 3, loss_bdry, 0.0))))


# ------------------------------------ JAX wrapper ------------------------------------
@jax.jit
def total_loss(y_hat, y, heaters, interfaces, Tenv):
    """y_hat, y: [B, T, 1, 13, 13]; heaters/interfaces: [B, 4]; Tenv: [B, 1]."""
    B, T, C, H, W = y_hat.shape
    assert C == 1 and H == NX and W == NY and T >= 2
    N = N_NODES

    kt_np, es_np, mask_np = _static_constants()
    kt = jnp.asarray(kt_np)          # constants baked into the jitted executable
    es_row = jnp.asarray(es_np)
    mask = jnp.asarray(mask_np)

    # batch-major [B, T, N]: pure reshape of NCHW, no transpose copy in HBM
    yh3 = y_hat.astype(jnp.float32).reshape(B, T, N)
    yt3 = y.astype(jnp.float32).reshape(B, T, N)

    heaters = heaters.astype(jnp.float32)
    interfaces = interfaces.astype(jnp.float32)
    tenv = Tenv.astype(jnp.float32).reshape(B, 1)

    # build_Q + fold sigma*E*Tenv^4 into a single per-batch constant row
    Q = jnp.zeros((B, N), jnp.float32)
    Q = Q.at[:, HEATER_IDX].add(heaters)
    Q = Q.at[:, INTF_IDX].add(interfaces)
    c_const = (Q + es_row * (tenv ** 4)).reshape(B, 1, N)

    # boundary targets scattered onto their interface nodes
    gtgt = jnp.zeros((B, N), jnp.float32).at[:, INTF_IDX].set(interfaces).reshape(B, 1, N)

    kernel = functools.partial(_total_loss_kernel, num_batches=B)

    in_specs = [
        pl.BlockSpec((N, N), lambda b: (0, 0)),            # K^T (resident across grid)
        pl.BlockSpec((1, N), lambda b: (0, 0)),            # sigma * diag(E)
        pl.BlockSpec((1, N), lambda b: (0, 0)),            # interface mask
        pl.BlockSpec((None, 1, N), lambda b: (b, 0, 0)),   # Q + sigma*E*Tenv^4 (per batch)
        pl.BlockSpec((None, 1, N), lambda b: (b, 0, 0)),   # boundary targets   (per batch)
        pl.BlockSpec((None, T, N), lambda b: (b, 0, 0)),   # y_hat normalized   (per batch)
        pl.BlockSpec((None, T, N), lambda b: (b, 0, 0)),   # y     normalized   (per batch)
    ]
    out_specs = pl.BlockSpec((1, 128), lambda b: (0, 0))
    out_shape = jax.ShapeDtypeStruct((1, 128), jnp.float32)

    fn = pl.pallas_call(
        kernel,
        out_shape=out_shape,
        grid_spec=pltpu.PrefetchScalarGridSpec(
            num_scalar_prefetch=0,
            grid=(B,),
            in_specs=in_specs,
            out_specs=out_specs,
            scratch_shapes=[
                pltpu.VMEM((T - 1, 1), jnp.float32),   # per-step sum_b sum_n |resid|
                pltpu.VMEM((1, 1), jnp.float32),       # sum (yh - y)^2
                pltpu.VMEM((1, 1), jnp.float32),       # sum boundary squared error
            ],
        ),
        # batch axis accumulates into scratch -> must stay serial ("arbitrary")
        compiler_params=pltpu.CompilerParams(dimension_semantics=("arbitrary",)),
    )
    out = fn(kt, es_row, mask, c_const, gtgt, yh3, yt3)
    return out[0, 0], out[0, 1], out[0, 2], out[0, 3]


# --------------------------- pure-JAX reference (for checking) ---------------------------
def reference(y_hat, y, heaters, interfaces, Tenv):
    B, T = y_hat.shape[0], y_hat.shape[1]
    N = N_NODES
    K_np, e_np = build_K_E()
    K = jnp.asarray(K_np)
    e_diag = jnp.asarray(e_np)

    loss_rec = jnp.mean((y_hat - y) ** 2)

    yhd = (y_hat.astype(jnp.float32) * DEN_SCALE + DEN_SHIFT).reshape(B, T, N)
    yd = (y.astype(jnp.float32) * DEN_SCALE + DEN_SHIFT).reshape(B, T, N)

    ti = yhd[:, :, jnp.array(INTF_NODES)]                     # [B, T, 4]
    loss_bdry = jnp.mean((ti - interfaces[:, None, :]) ** 2)

    Q = jnp.zeros((B, N), jnp.float32)
    Q = Q.at[:, jnp.array(HEATER_NODES)].add(heaters)
    Q = Q.at[:, jnp.array(INTF_NODES)].add(interfaces)
    Tenv_b = Tenv.reshape(B, 1)

    acc = jnp.zeros((), jnp.float32)
    for t in range(T - 1):
        T_old = yd[:, t]
        T_new = yhd[:, t + 1]
        kt = jnp.dot(T_old, K.T, precision=lax.Precision.HIGHEST)
        rad = e_diag[None, :] * (T_old ** 4 - Tenv_b ** 4)
        rhs = Q - kt - SIGMA * rad
        lhs = (VOL_HEAT / DT) * (T_new - T_old)
        loss_t = jnp.mean(jnp.abs(lhs - rhs))
        acc = acc + loss_t ** 2
    loss_phys = acc / (T - 1)
    total = LAMBDA_REC * loss_rec + LAMBDA_PHYS * loss_phys + LAMBDA_BDRY * loss_bdry
    return total, loss_rec, loss_phys, loss_bdry


if __name__ == "__main__":
    key = jax.random.PRNGKey(0)
    k1, k2, k3, k4, k5 = jax.random.split(key, 5)
    B, T = 2, 6
    y_hat = jax.random.normal(k1, (B, T, 1, NX, NY), jnp.float32)       # normalized preds
    y = jax.random.normal(k2, (B, T, 1, NX, NY), jnp.float32)           # normalized targets
    heaters = jax.random.uniform(k3, (B, 4), jnp.float32, 0.0, 5.0)     # heater powers [W]
    interfaces = 290.0 + 10.0 * jax.random.normal(k4, (B, 4), jnp.float32)  # interface temps [K]
    Tenv = 280.0 + 5.0 * jax.random.normal(k5, (B, 1), jnp.float32)     # environment temp [K]

    outs = jax.block_until_ready(total_loss(y_hat, y, heaters, interfaces, Tenv))
    got = np.array([float(o) for o in outs])

    want = np.array([float(r) for r in reference(y_hat, y, heaters, interfaces, Tenv)])

    np.testing.assert_allclose(got, want, rtol=1e-3, atol=1e-3)
    print("KERNEL_OK")
</pallas_src>

<mosaic_0001>
module attributes {stable_mosaic.version = 11 : i64} {
  func.func @_total_loss_kernel(%arg0: i32, %arg1: memref<169x169xf32, #tpu.memory_space<vmem>>, %arg2: memref<1x169xf32, #tpu.memory_space<vmem>>, %arg3: memref<1x169xf32, #tpu.memory_space<vmem>>, %arg4: memref<1x1x169xf32, #tpu.memory_space<vmem>>, %arg5: memref<1x1x169xf32, #tpu.memory_space<vmem>>, %arg6: memref<1x6x169xf32, #tpu.memory_space<vmem>>, %arg7: memref<1x6x169xf32, #tpu.memory_space<vmem>>, %arg8: memref<1x128xf32, #tpu.memory_space<vmem>>, %arg9: memref<5x1xf32, #tpu.memory_space<vmem>>, %arg10: memref<1x1xf32, #tpu.memory_space<vmem>>, %arg11: memref<1x1xf32, #tpu.memory_space<vmem>>) attributes {dimension_semantics = [#tpu.dimension_semantics<arbitrary>], iteration_bounds = array<i64: 2>, scalar_prefetch = 0 : i64, scratch_operands = 3 : i64, tpu.core_type = #tpu.core_type<tc>, window_params = [{pipeline_mode = #tpu.pipeline_mode<synchronous>, transform_indices = @transform_0, window_bounds = array<i64: 169, 169>}, {pipeline_mode = #tpu.pipeline_mode<synchronous>, transform_indices = @transform_1, window_bounds = array<i64: 1, 169>}, {pipeline_mode = #tpu.pipeline_mode<synchronous>, transform_indices = @transform_2, window_bounds = array<i64: 1, 169>}, {transform_indices = @transform_3, window_bounds = array<i64: 1, 1, 169>}, {transform_indices = @transform_4, window_bounds = array<i64: 1, 1, 169>}, {transform_indices = @transform_5, window_bounds = array<i64: 1, 6, 169>}, {transform_indices = @transform_6, window_bounds = array<i64: 1, 6, 169>}, {pipeline_mode = #tpu.pipeline_mode<synchronous>, transform_indices = @transform_7, window_bounds = array<i64: 1, 128>}]} {
    %c0_i32 = arith.constant 0 : i32
    %0 = arith.cmpi eq, %arg0, %c0_i32 : i32
    %1 = arith.extui %0 : i1 to i32
    %c0_i32_0 = arith.constant 0 : i32
    %2 = arith.cmpi ne, %1, %c0_i32_0 : i32
    scf.if %2 {
      %cst_39 = arith.constant 0.000000e+00 : f32
      %68 = vector.broadcast %cst_39 : f32 to vector<5x1xf32>
      %c0_40 = arith.constant 0 : index
      %c0_41 = arith.constant 0 : index
      %69 = vector.load %arg9[%c0_40, %c0_41] : memref<5x1xf32, #tpu.memory_space<vmem>>, vector<5x1xf32>
      tpu.vector_store %arg9[%c0_40, %c0_41], %68 {strides = array<i32>} : memref<5x1xf32, #tpu.memory_space<vmem>>, vector<5x1xf32>,
      %cst_42 = arith.constant 0.000000e+00 : f32
      %70 = vector.broadcast %cst_42 : f32 to vector<1x1xf32>
      %c0_43 = arith.constant 0 : index
      %c0_44 = arith.constant 0 : index
      %71 = vector.load %arg10[%c0_43, %c0_44] : memref<1x1xf32, #tpu.memory_space<vmem>>, vector<1x1xf32>
      tpu.vector_store %arg10[%c0_43, %c0_44], %70 {strides = array<i32>} : memref<1x1xf32, #tpu.memory_space<vmem>>, vector<1x1xf32>,
      %cst_45 = arith.constant 0.000000e+00 : f32
      %72 = vector.broadcast %cst_45 : f32 to vector<1x1xf32>
      %c0_46 = arith.constant 0 : index
      %c0_47 = arith.constant 0 : index
      %73 = vector.load %arg11[%c0_46, %c0_47] : memref<1x1xf32, #tpu.memory_space<vmem>>, vector<1x1xf32>
      tpu.vector_store %arg11[%c0_46, %c0_47], %72 {strides = array<i32>} : memref<1x1xf32, #tpu.memory_space<vmem>>, vector<1x1xf32>,
    } else {
    }
    %c0 = arith.constant 0 : index
    %c0_1 = arith.constant 0 : index
    %c0_2 = arith.constant 0 : index
    %3 = vector.load %arg6[%c0, %c0_1, %c0_2] : memref<1x6x169xf32, #tpu.memory_space<vmem>>, vector<1x6x169xf32>
    %4 = vector.shape_cast %3 : vector<1x6x169xf32> to vector<6x169xf32>
    %c0_3 = arith.constant 0 : index
    %c0_4 = arith.constant 0 : index
    %c0_5 = arith.constant 0 : index
    %5 = vector.load %arg7[%c0_3, %c0_4, %c0_5] : memref<1x6x169xf32, #tpu.memory_space<vmem>>, vector<1x6x169xf32>
    %6 = vector.shape_cast %5 : vector<1x6x169xf32> to vector<6x169xf32>
    %7 = arith.subf %4, %6 : vector<6x169xf32>
    %c0_6 = arith.constant 0 : index
    %c0_7 = arith.constant 0 : index
    %8 = vector.load %arg10[%c0_6, %c0_7] : memref<1x1xf32, #tpu.memory_space<vmem>>, vector<1x1xf32>
    %9 = arith.mulf %7, %7 : vector<6x169xf32>
    %10 = vector.shape_cast %9 : vector<6x169xf32> to vector<1x6x169xf32>
    %cst = arith.constant dense<0.000000e+00> : vector<1xf32>
    %11 = vector.multi_reduction <add>, %10, %cst [1, 2] : vector<1x6x169xf32> to vector<1xf32>
    %12 = vector.shape_cast %11 : vector<1xf32> to vector<1x1x1xf32>
    %13 = vector.extract %12[0, 0, 0] : f32 from vector<1x1x1xf32>
    %14 = vector.broadcast %13 : f32 to vector<1x1xf32>
    %15 = arith.addf %8, %14 : vector<1x1xf32>
    %c0_8 = arith.constant 0 : index
    %c0_9 = arith.constant 0 : index
    %16 = vector.load %arg10[%c0_8, %c0_9] : memref<1x1xf32, #tpu.memory_space<vmem>>, vector<1x1xf32>
    tpu.vector_store %arg10[%c0_8, %c0_9], %15 {strides = array<i32>} : memref<1x1xf32, #tpu.memory_space<vmem>>, vector<1x1xf32>,
    %cst_10 = arith.constant 4.000000e+01 : f32
    %17 = vector.broadcast %cst_10 : f32 to vector<6x169xf32>
    %18 = arith.mulf %4, %17 : vector<6x169xf32>
    %cst_11 = arith.constant 3.000000e+02 : f32
    %19 = vector.broadcast %cst_11 : f32 to vector<6x169xf32>
    %20 = arith.addf %18, %19 : vector<6x169xf32>
    %cst_12 = arith.constant 4.000000e+01 : f32
    %21 = vector.broadcast %cst_12 : f32 to vector<6x169xf32>
    %22 = arith.mulf %6, %21 : vector<6x169xf32>
    %cst_13 = arith.constant 3.000000e+02 : f32
    %23 = vector.broadcast %cst_13 : f32 to vector<6x169xf32>
    %24 = arith.addf %22, %23 : vector<6x169xf32>
    %c0_14 = arith.constant 0 : index
    %c0_15 = arith.constant 0 : index
    %c0_16 = arith.constant 0 : index
    %25 = vector.load %arg5[%c0_14, %c0_15, %c0_16] : memref<1x1x169xf32, #tpu.memory_space<vmem>>, vector<1x1x169xf32>
    %26 = vector.shape_cast %25 : vector<1x1x169xf32> to vector<1x169xf32>
    %27 = vector.broadcast %26 : vector<1x169xf32> to vector<6x169xf32>
    %28 = arith.subf %20, %27 : vector<6x169xf32>
    %c0_17 = arith.constant 0 : index
    %c0_18 = arith.constant 0 : index
    %29 = vector.load %arg11[%c0_17, %c0_18] : memref<1x1xf32, #tpu.memory_space<vmem>>, vector<1x1xf32>
    %30 = arith.mulf %28, %28 : vector<6x169xf32>
    %c0_19 = arith.constant 0 : index
    %c0_20 = arith.constant 0 : index
    %31 = vector.load %arg3[%c0_19, %c0_20] : memref<1x169xf32, #tpu.memory_space<vmem>>, vector<1x169xf32>
    %32 = vector.broadcast %31 : vector<1x169xf32> to vector<6x169xf32>
    %33 = arith.mulf %30, %32 : vector<6x169xf32>
    %34 = vector.shape_cast %33 : vector<6x169xf32> to vector<1x6x169xf32>
    %cst_21 = arith.constant dense<0.000000e+00> : vector<1xf32>
    %35 = vector.multi_reduction <add>, %34, %cst_21 [1, 2] : vector<1x6x169xf32> to vector<1xf32>
    %36 = vector.shape_cast %35 : vector<1xf32> to vector<1x1x1xf32>
    %37 = vector.extract %36[0, 0, 0] : f32 from vector<1x1x1xf32>
    %38 = vector.broadcast %37 : f32 to vector<1x1xf32>
    %39 = arith.addf %29, %38 : vector<1x1xf32>
    %c0_22 = arith.constant 0 : index
    %c0_23 = arith.constant 0 : index
    %40 = vector.load %arg11[%c0_22, %c0_23] : memref<1x1xf32, #tpu.memory_space<vmem>>, vector<1x1xf32>
    tpu.vector_store %arg11[%c0_22, %c0_23], %39 {strides = array<i32>} : memref<1x1xf32, #tpu.memory_space<vmem>>, vector<1x1xf32>,
    %41 = vector.extract_strided_slice %24 {offsets = [0, 0], sizes = [5, 169], strides = [1, 1]} : vector<6x169xf32> to vector<5x169xf32>
    %42 = vector.extract_strided_slice %20 {offsets = [1, 0], sizes = [5, 169], strides = [1, 1]} : vector<6x169xf32> to vector<5x169xf32>
    %c0_24 = arith.constant 0 : index
    %c0_25 = arith.constant 0 : index
    %43 = vector.load %arg1[%c0_24, %c0_25] : memref<169x169xf32, #tpu.memory_space<vmem>>, vector<169x169xf32>
    %cst_26 = arith.constant dense<0.000000e+00> : vector<5x169xf32>
    %44 = tpu.matmul %41, %43, %cst_26 {dimension_numbers = #tpu.dot_dimension_numbers<[1], [0], [0], [1], [0, 0, 1, 1], [], []>, precision = #tpu.contract_precision<fp32>} : vector<5x169xf32>, vector<169x169xf32>, vector<5x169xf32> -> vector<5x169xf32>
    %45 = arith.mulf %41, %41 : vector<5x169xf32>
    %c0_27 = arith.constant 0 : index
    %c0_28 = arith.constant 0 : index
    %46 = vector.load %arg2[%c0_27, %c0_28] : memref<1x169xf32, #tpu.memory_space<vmem>>, vector<1x169xf32>
    %47 = arith.mulf %45, %45 : vector<5x169xf32>
    %48 = vector.broadcast %46 : vector<1x169xf32> to vector<5x169xf32>
    %49 = arith.mulf %48, %47 : vector<5x169xf32>
    %50 = arith.subf %42, %41 : vector<5x169xf32>
    %cst_29 = arith.constant 1.687500e-01 : f32
    %51 = vector.broadcast %cst_29 : f32 to vector<5x169xf32>
    %52 = arith.mulf %51, %50 : vector<5x169xf32>
    %c0_30 = arith.constant 0 : index
    %c0_31 = arith.constant 0 : index
    %c0_32 = arith.constant 0 : index
    %53 = vector.load %arg4[%c0_30, %c0_31, %c0_32] : memref<1x1x169xf32, #tpu.memory_space<vmem>>, vector<1x1x169xf32>
    %54 = vector.shape_cast %53 : vector<1x1x169xf32> to vector<1x169xf32>
    %55 = vector.broadcast %54 : vector<1x169xf32> to vector<5x169xf32>
    %56 = arith.subf %55, %44 : vector<5x169xf32>
    %57 = arith.subf %56, %49 : vector<5x169xf32>
    %58 = arith.subf %52, %57 : vector<5x169xf32>
    %c0_33 = arith.constant 0 : index
    %c0_34 = arith.constant 0 : index
    %59 = vector.load %arg9[%c0_33, %c0_34] : memref<5x1xf32, #tpu.memory_space<vmem>>, vector<5x1xf32>
    %60 = math.absf %58 : vector<5x169xf32>
    %cst_35 = arith.constant dense<0.000000e+00> : vector<5xf32>
    %61 = vector.multi_reduction <add>, %60, %cst_35 [1] : vector<5x169xf32> to vector<5xf32>
    %62 = vector.shape_cast %61 : vector<5xf32> to vector<5x1xf32>
    %63 = arith.addf %59, %62 : vector<5x1xf32>
    %c0_36 = arith.constant 0 : index
    %c0_37 = arith.constant 0 : index
    %64 = vector.load %arg9[%c0_36, %c0_37] : memref<5x1xf32, #tpu.memory_space<vmem>>, vector<5x1xf32>
    tpu.vector_store %arg9[%c0_36, %c0_37], %63 {strides = array<i32>} : memref<5x1xf32, #tpu.memory_space<vmem>>, vector<5x1xf32>,
    %c1_i32 = arith.constant 1 : i32
    %65 = arith.cmpi eq, %arg0, %c1_i32 : i32
    %66 = arith.extui %65 : i1 to i32
    %c0_i32_38 = arith.constant 0 : i32
    %67 = arith.cmpi ne, %66, %c0_i32_38 : i32
    scf.if %67 {
      %c0_39 = arith.constant 0 : index
      %c0_40 = arith.constant 0 : index
      %68 = vector.load %arg10[%c0_39, %c0_40] : memref<1x1xf32, #tpu.memory_space<vmem>>, vector<1x1xf32>
      %69 = vector.shape_cast %68 : vector<1x1xf32> to vector<1x1x1xf32>
      %cst_41 = arith.constant dense<0.000000e+00> : vector<1xf32>
      %70 = vector.multi_reduction <add>, %69, %cst_41 [1, 2] : vector<1x1x1xf32> to vector<1xf32>
      %71 = vector.shape_cast %70 : vector<1xf32> to vector<1x1x1xf32>
      %72 = vector.extract %71[0, 0, 0] : f32 from vector<1x1x1xf32>
      %cst_42 = arith.constant 4.93096653E-4 : f32
      %73 = arith.mulf %72, %cst_42 : f32
      %c0_43 = arith.constant 0 : index
      %c0_44 = arith.constant 0 : index
      %74 = vector.load %arg11[%c0_43, %c0_44] : memref<1x1xf32, #tpu.memory_space<vmem>>, vector<1x1xf32>
      %75 = vector.shape_cast %74 : vector<1x1xf32> to vector<1x1x1xf32>
      %cst_45 = arith.constant dense<0.000000e+00> : vector<1xf32>
      %76 = vector.multi_reduction <add>, %75, %cst_45 [1, 2] : vector<1x1x1xf32> to vector<1xf32>
      %77 = vector.shape_cast %76 : vector<1xf32> to vector<1x1x1xf32>
      %78 = vector.extract %77[0, 0, 0] : f32 from vector<1x1x1xf32>
      %cst_46 = arith.constant 0.020833334 : f32
      %79 = arith.mulf %78, %cst_46 : f32
      %c0_47 = arith.constant 0 : index
      %c0_48 = arith.constant 0 : index
      %80 = vector.load %arg9[%c0_47, %c0_48] : memref<5x1xf32, #tpu.memory_space<vmem>>, vector<5x1xf32>
      %cst_49 = arith.constant 2.958580e-03 : f32
      %81 = vector.broadcast %cst_49 : f32 to vector<5x1xf32>
      %82 = arith.mulf %80, %81 : vector<5x1xf32>
      %83 = arith.mulf %82, %82 : vector<5x1xf32>
      %84 = vector.shape_cast %83 : vector<5x1xf32> to vector<1x5x1xf32>
      %cst_50 = arith.constant dense<0.000000e+00> : vector<1xf32>
      %85 = vector.multi_reduction <add>, %84, %cst_50 [1, 2] : vector<1x5x1xf32> to vector<1xf32>
      %86 = vector.shape_cast %85 : vector<1xf32> to vector<1x1x1xf32>
      %87 = vector.extract %86[0, 0, 0] : f32 from vector<1x1x1xf32>
      %cst_51 = arith.constant 2.000000e-01 : f32
      %88 = arith.mulf %87, %cst_51 : f32
      %cst_52 = arith.constant 1.000000e+00 : f32
      %89 = arith.mulf %cst_52, %73 : f32
      %cst_53 = arith.constant 1.000000e+00 : f32
      %90 = arith.mulf %cst_53, %88 : f32
      %91 = arith.addf %89, %90 : f32
      %cst_54 = arith.constant 1.000000e+00 : f32
      %92 = arith.mulf %cst_54, %79 : f32
      %93 = arith.addf %91, %92 : f32
      %94 = tpu.iota {dimensions = array<i32: 1>} : vector<1x128xi32>
      %c0_i32_55 = arith.constant 0 : i32
      %95 = vector.broadcast %c0_i32_55 : i32 to vector<1x128xi32>
      %96 = arith.cmpi eq, %94, %95 : vector<1x128xi32>
      %c1_i32_56 = arith.constant 1 : i32
      %97 = vector.broadcast %c1_i32_56 : i32 to vector<1x128xi32>
      %98 = arith.cmpi eq, %94, %97 : vector<1x128xi32>
      %c2_i32 = arith.constant 2 : i32
      %99 = vector.broadcast %c2_i32 : i32 to vector<1x128xi32>
      %100 = arith.cmpi eq, %94, %99 : vector<1x128xi32>
      %c3_i32 = arith.constant 3 : i32
      %101 = vector.broadcast %c3_i32 : i32 to vector<1x128xi32>
      %102 = arith.cmpi eq, %94, %101 : vector<1x128xi32>
      %cst_57 = arith.constant 0.000000e+00 : f32
      %103 = vector.broadcast %79 : f32 to vector<1x128xf32>
      %104 = vector.broadcast %cst_57 : f32 to vector<1x128xf32>
      %105 = arith.select %102, %103, %104 : vector<1x128xi1>, vector<1x128xf32>
      %106 = vector.broadcast %88 : f32 to vector<1x128xf32>
      %107 = arith.select %100, %106, %105 : vector<1x128xi1>, vector<1x128xf32>
      %108 = vector.broadcast %73 : f32 to vector<1x128xf32>
      %109 = arith.select %98, %108, %107 : vector<1x128xi1>, vector<1x128xf32>
      %110 = vector.broadcast %93 : f32 to vector<1x128xf32>
      %111 = arith.select %96, %110, %109 : vector<1x128xi1>, vector<1x128xf32>
      %c0_58 = arith.constant 0 : index
      %c0_59 = arith.constant 0 : index
      %112 = vector.load %arg8[%c0_58, %c0_59] : memref<1x128xf32, #tpu.memory_space<vmem>>, vector<1x128xf32>
      tpu.vector_store %arg8[%c0_58, %c0_59], %111 {strides = array<i32>} : memref<1x128xf32, #tpu.memory_space<vmem>>, vector<1x128xf32>,
    } else {
    }
    return
  }
  func.func @transform_0(%arg0: i32) -> (i32, i32) {
    %c0_i32 = arith.constant 0 : i32
    %c0_i32_0 = arith.constant 0 : i32
    %c0_i32_1 = arith.constant 0 : i32
    return %c0_i32, %c0_i32_0 : i32, i32
  }
  func.func @transform_1(%arg0: i32) -> (i32, i32) {
    %c0_i32 = arith.constant 0 : i32
    %c0_i32_0 = arith.constant 0 : i32
    %c0_i32_1 = arith.constant 0 : i32
    return %c0_i32, %c0_i32_0 : i32, i32
  }
  func.func @transform_2(%arg0: i32) -> (i32, i32) {
    %c0_i32 = arith.constant 0 : i32
    %c0_i32_0 = arith.constant 0 : i32
    %c0_i32_1 = arith.constant 0 : i32
    return %c0_i32, %c0_i32_0 : i32, i32
  }
  func.func @transform_3(%arg0: i32) -> (i32, i32, i32) {
    %c0_i32 = arith.constant 0 : i32
    %c0_i32_0 = arith.constant 0 : i32
    %c0_i32_1 = arith.constant 0 : i32
    return %arg0, %c0_i32, %c0_i32_0 : i32, i32, i32
  }
  func.func @transform_4(%arg0: i32) -> (i32, i32, i32) {
    %c0_i32 = arith.constant 0 : i32
    %c0_i32_0 = arith.constant 0 : i32
    %c0_i32_1 = arith.constant 0 : i32
    return %arg0, %c0_i32, %c0_i32_0 : i32, i32, i32
  }
  func.func @transform_5(%arg0: i32) -> (i32, i32, i32) {
    %c0_i32 = arith.constant 0 : i32
    %c0_i32_0 = arith.constant 0 : i32
    %c0_i32_1 = arith.constant 0 : i32
    return %arg0, %c0_i32, %c0_i32_0 : i32, i32, i32
  }
  func.func @transform_6(%arg0: i32) -> (i32, i32, i32) {
    %c0_i32 = arith.constant 0 : i32
    %c0_i32_0 = arith.constant 0 : i32
    %c0_i32_1 = arith.constant 0 : i32
    return %arg0, %c0_i32, %c0_i32_0 : i32, i32, i32
  }
  func.func @transform_7(%arg0: i32) -> (i32, i32) {
    %c0_i32 = arith.constant 0 : i32
    %c0_i32_0 = arith.constant 0 : i32
    %c0_i32_1 = arith.constant 0 : i32
    return %c0_i32, %c0_i32_0 : i32, i32
  }
}

</mosaic_0001>

<bundles_post_ra>
// kernel: total_loss.1
= control target key start
LH: loop header
LB: loop body
LE: loop exit
PB: predicated region body
PF: predicated region fallthrough
CT: control target
= control target key end

     0   :  { %s1745_s24 = smov 0   ;;  %s2811_s0 = inlined_call_operand.vmem [shape: f32[169,169], index: 0, kind: input, shape index: {}]   ;;  %s2812_s1 = inlined_call_operand.vmem [shape: f32[1,169], index: 1, kind: input, shape index: {}]   ;;  %s2813_s2 = inlined_call_operand.vmem [shape: f32[1,169], index: 2, kind: input, shape index: {}]   ;;  %s2814_s3 = inlined_call_operand.vmem [shape: f32[2,1,169], index: 3, kind: input, shape index: {}]   ;;  %s2815_s4 = inlined_call_operand.vmem [shape: f32[2,1,169], index: 4, kind: input, shape index: {}]   ;;  %s2816_s5 = inlined_call_operand.vmem [shape: f32[2,6,169], index: 5, kind: input, shape index: {}]   ;;  %s2817_s6 = inlined_call_operand.vmem [shape: f32[2,6,169], index: 6, kind: input, shape index: {}]   ;;  %s2818_s7 = inlined_call_operand.vmem [shape: f32[1,128], index: 7, kind: output, shape index: {}]  }
   0x1 LB: > { %s1751_s25 = sadd.s32 4294967295, %s1702_s24   ;;  %p1664_p0 = scmp.ge.s32.totalorder %s1702_s24, 1  ;;  %s1702_s24 = sphi %s1745_s24, %s17_s24  }
   0x2   : > { %p260_p1 = scmp.lt.s32.totalorder %s1702_s24, 3 }
   0x4   : > { %p261_p2 = pnand %p1664_p0, %p260_p1 }
   0x6   : > { %264 = sbr.rel (%p261_p2) target bundleno = 758 (0x2f6), region = 48 }
   0xb   : > { %p300_p3 = scmp.lt.s32.totalorder %s1751_s25, 1  ;;  %p1671_p4 = scmp.ne.s32.totalorder %s1751_s25, 0 }
   0xd   : > { %s301_s26 = scalar_select %p300_p3, %s1751_s25, 1 }
   0xe   : > { %321 = sbr.rel (%p1671_p4) target bundleno = 22 (0x16), region = 52 }
   0xf   : > { %s1665_s27 = sshll.u32 %s301_s26, 1  ;;  %s1675_s28 = sshll.u32 %s301_s26, 4 }
  0x10   : > { %s1760_s8 = scalar_lea.vmem %s2814_s3, %s1665_s27  ;;  %s1765_s11 = scalar_lea.vmem %s2815_s4, %s1665_s27 }
  0x11   : > { %s1770_s14 = scalar_lea.vmem %s2816_s5, %s1675_s28  ;;  %s1775_s17 = scalar_lea.vmem %s2817_s6, %s1675_s28 }
  0x13   : > { %vm322_vm0 = vcmask 4096   ;;  %vm324_vm1 = vcmask 0   ;;  %v1704_v0 = vmov 0.0  }
  0x14   : > { %323 = vst.msk [vmem:[#allocation2] sm:$0x1f] %vm322_vm0, %v1704_v0 }
  0x15   : > { %325 = vst.msk [vmem:[#allocation3] sm:$0x1] %vm324_vm1, %v1704_v0  ;;  %326 = vst.msk [vmem:[#allocation4] sm:$0x1] %vm324_vm1, %v1704_v0 }
  0x16 PF: > { %v439_v1 = vld [vmem:[%s2811_s0 + $0xf8] sm:$0xff]  ;;  %v438_v2 = vld [vmem:[%s2811_s0 + $0xf0] sm:$0xff]  ;;  %v437_v3 = vld [vmem:[%s2811_s0 + $0xe8] sm:$0xff]  ;;  %vm456_vm2 = vcmask 1040384   ;;  %vm452_vm3 = vcmask 334848   ;;  %vm336_vm4 = vcmask 1045504  }
  0x17   : > { %v1787_v4 = vand.u32 4294901760, %v439_v1  ;;  %v1789_v5 = vand.u32 4294901760, %v438_v2  ;;  %v1791_v6 = vand.u32 4294901760, %v437_v3  ;;  %v436_v7 = vld [vmem:[%s2811_s0 + $0xe0] sm:$0xff]  ;;  %v435_v8 = vld [vmem:[%s2811_s0 + $0xd8] sm:$0xff]  ;;  %v434_v9 = vld [vmem:[%s2811_s0 + $0xd0] sm:$0xff] }
  0x18   : > { %v1802_v10 = vand.u32 4294901760, %v436_v7  ;;  %v1804_v11 = vand.u32 4294901760, %v435_v8  ;;  %v1806_v12 = vand.u32 4294901760, %v434_v9  ;;  %v433_v13 = vld [vmem:[%s2811_s0 + $0xc8] sm:$0xff]  ;;  %v432_v14 = vld [vmem:[%s2811_s0 + $0xc0] sm:$0xff]  ;;  %v431_v15 = vld [vmem:[%s2811_s0 + $0xb8] sm:$0xff] }
  0x19   : > { %464 = vmatprep.subr.mxu0 %v1787_v4  ;;  %v1818_v16 = vand.u32 4294901760, %v433_v13  ;;  %v1820_v17 = vand.u32 4294901760, %v432_v14  ;;  %v1822_v18 = vand.u32 4294901760, %v431_v15  ;;  %v1825_v19 = vsub.f32 %v439_v1, %v1787_v4  ;;  %v1830_v20 = vld [vmem:[%s2811_s0 + $0xb0] sm:$0xff]  ;;  %v1835_v21 = vld [vmem:[%s2811_s0 + $0xa8] sm:$0xff]  ;;  %v1840_v22 = vld [vmem:[%s2811_s0 + $0xa0] sm:$0xff] }
  0x1a   : > { %466 = vmatpush1.msra.mxu0 %v1789_v5  ;;  %v1844_v23 = vand.u32 4294901760, %v1830_v20  ;;  %v1847_v24 = vsub.f32 %v438_v2, %v1789_v5  ;;  %v1850_v25 = vand.u32 4294901760, %v1835_v21  ;;  %v1853_v26 = vsub.f32 %v437_v3, %v1791_v6  ;;  %v1858_v27 = vld [vmem:[%s2811_s0 + $0x98] sm:$0xff]  ;;  %v1863_v28 = vld [vmem:[%s2811_s0 + $0x90] sm:$0xff]  ;;  %v1868_v29 = vld [vmem:[%s2811_s0 + $0x88] sm:$0xff]  ;;  %p1672_p5 = scmp.ne.s32.totalorder %s1751_s25, 1 }
  0x1b   : > { %2947 = vst [vmem:[#allocation5_spill] sm:$0xff] %v1825_v19  ;;  %468 = vmatprep.subr.mxu0 %v1791_v6  ;;  %v2832_v30 = vand.u32 4294901760, %v1825_v19  ;;  %v1873_v31 = vand.u32 4294901760, %v1840_v22  ;;  %v1876_v32 = vsub.f32 %v436_v7, %v1802_v10  ;;  %v1879_v33 = vand.u32 4294901760, %v1858_v27  ;;  %v1893_v38 = vld [vmem:[%s2811_s0 + $0x80] sm:$0xff]  ;;  %v1920_v47 = vld [vmem:[%s2811_s0 + $0x78] sm:$0xff] }
  0x1c   : > { %470 = vmatpush1.msra.mxu0 %v1802_v10  ;;  %v2831_v34 = vand.u32 4294901760, %v1847_v24  ;;  %v2829_v35 = vand.u32 4294901760, %v1853_v26  ;;  %v1885_v36 = vsub.f32 %v435_v8, %v1804_v11  ;;  %v1888_v37 = vand.u32 4294901760, %v1863_v28  ;;  %v1933_v52 = vld [vmem:[%s2811_s0 + $0x70] sm:$0xff]  ;;  %v1943_v57 = vld [vmem:[%s2811_s0 + $0x68] sm:$0xff]  ;;  %v1958_v62 = vld [vmem:[%s2811_s0 + $0x60] sm:$0xff] }
  0x1d   : > { %2948 = vst [vmem:[#allocation6_spill] sm:$0xff] %v1879_v33  ;;  %472 = vmatprep.subr.mxu0 %v1804_v11  ;;  %v591_v39 = vsub.f32 %v1825_v19, %v2832_v30  ;;  %v2828_v40 = vand.u32 4294901760, %v1876_v32  ;;  %v1901_v41 = vsub.f32 %v434_v9, %v1806_v12  ;;  %v1904_v42 = vand.u32 4294901760, %v1868_v29  ;;  %v1973_v3 = vld [vmem:[%s2811_s0 + $0x58] sm:$0xff] }
  0x1e   : > { %2949 = vst [vmem:[#allocation7_spill] sm:$0xff] %v1888_v37  ;;  %474 = vmatpush1.msra.mxu0 %v1806_v12  ;;  %v597_v43 = vsub.f32 %v1847_v24, %v2831_v34  ;;  %v603_v44 = vsub.f32 %v1853_v26, %v2829_v35  ;;  %v2826_v45 = vand.u32 4294901760, %v1885_v36  ;;  %v1915_v46 = vsub.f32 %v433_v13, %v1818_v16  ;;  %v2109_v34 = vld [vmem:[%s2811_s0 + $0x18] sm:$0xff] }
  0x1f   : > { %2950 = vst [vmem:[#allocation8_spill] sm:$0xff] %v1904_v42  ;;  %476 = vmatprep.subr.mxu0 %v1818_v16  ;;  %v592_v48 = vand.u32 4294901760, %v591_v39  ;;  %v609_v49 = vsub.f32 %v1876_v32, %v2828_v40  ;;  %v2824_v50 = vand.u32 4294901760, %v1901_v41  ;;  %v1928_v51 = vand.u32 4294901760, %v1893_v38 }
  0x20   : > { %478 = vmatpush1.msra.mxu0 %v1820_v17  ;;  %v598_v53 = vand.u32 4294901760, %v597_v43  ;;  %v604_v54 = vand.u32 4294901760, %v603_v44  ;;  %v615_v55 = vsub.f32 %v1885_v36, %v2826_v45  ;;  %v2823_v56 = vand.u32 4294901760, %v1915_v46  ;;  %v2082_v45 = vld [vmem:[%s2811_s0 + $0x28] sm:$0xff] }
  0x21   : > { %2951 = vst [vmem:[#allocation9_spill] sm:$0xff] %v1928_v51  ;;  %480 = vmatprep.subr.mxu0 %v1822_v18  ;;  %593 = vmatprep.subr.mxu1 %v592_v48  ;;  %v610_v58 = vand.u32 4294901760, %v609_v49  ;;  %v621_v59 = vsub.f32 %v1901_v41, %v2824_v50  ;;  %v1950_v60 = vsub.f32 %v432_v14, %v1820_v17  ;;  %v1953_v61 = vand.u32 4294901760, %v1920_v47  ;;  %v1987_v14 = vld [vmem:[%s2811_s0 + $0x50] sm:$0xff] }
  0x22   : > { %482 = vmatpush1.msra.mxu0 %v1844_v23  ;;  %599 = vmatpush1.msra.mxu1 %v598_v53  ;;  %v616_v63 = vand.u32 4294901760, %v615_v55  ;;  %v627_v0 = vsub.f32 %v1915_v46, %v2823_v56  ;;  %v1965_v1 = vsub.f32 %v431_v15, %v1822_v18  ;;  %v1968_v2 = vand.u32 4294901760, %v1933_v52  ;;  %v2066_v50 = vld [vmem:[%s2811_s0 + $0x30] sm:$0xff] }
  0x23   : > { %2952 = vst [vmem:[#allocation10_spill] sm:$0xff] %v1953_v61  ;;  %484 = vmatprep.subr.mxu0 %v1850_v25  ;;  %605 = vmatprep.subr.mxu1 %v604_v54  ;;  %v622_v7 = vand.u32 4294901760, %v621_v59  ;;  %v2821_v8 = vand.u32 4294901760, %v1950_v60  ;;  %v1979_v9 = vsub.f32 %v1830_v20, %v1844_v23  ;;  %v1982_v13 = vand.u32 4294901760, %v1943_v57 }
  0x24   : > { %2953 = vst [vmem:[#allocation11_spill] sm:$0xff] %v1968_v2  ;;  %486 = vmatpush1.msra.mxu0 %v1873_v31  ;;  %611 = vmatpush1.msra.mxu1 %v610_v58  ;;  %v628_v15 = vand.u32 4294901760, %v627_v0  ;;  %v2819_v39 = vand.u32 4294901760, %v1965_v1  ;;  %v1993_v43 = vsub.f32 %v1835_v21, %v1850_v25  ;;  %v1996_v20 = vand.u32 4294901760, %v1958_v62  ;;  %v2013_v21 = vld [vmem:[%s2811_s0 + $0x48] sm:$0xff] }
  0x25   : > { %2954 = vst [vmem:[#allocation12_spill] sm:$0xff] %v1982_v13  ;;  %488 = vmatprep.subr.mxu0 %v1879_v33  ;;  %617 = vmatprep.subr.mxu1 %v616_v63  ;;  %v633_v44 = vsub.f32 %v1950_v60, %v2821_v8  ;;  %v2820_v48 = vand.u32 4294901760, %v1979_v9  ;;  %v2005_v49 = vsub.f32 %v1840_v22, %v1873_v31  ;;  %v2008_v53 = vand.u32 4294901760, %v1973_v3 }
  0x26   : > { %2955 = vst [vmem:[#allocation13_spill] sm:$0xff] %v1996_v20  ;;  %490 = vmatpush1.msra.mxu0 %v1888_v37  ;;  %623 = vmatpush1.msra.mxu1 %v622_v7  ;;  %v639_v54 = vsub.f32 %v1965_v1, %v2819_v39  ;;  %v2822_v55 = vand.u32 4294901760, %v1993_v43  ;;  %v2022_v22 = vsub.f32 %v1858_v27, %v1879_v33  ;;  %v2025_v58 = vand.u32 4294901760, %v1987_v14  ;;  %v2039_v27 = vld [vmem:[%s2811_s0 + $0x40] sm:$0xff] }
  0x27   : > { %2956 = vst [vmem:[#allocation14_spill] sm:$0xff] %v2008_v53  ;;  %492 = vmatprep.subr.mxu0 %v1904_v42  ;;  %629 = vmatprep.subr.mxu1 %v628_v15  ;;  %v634_v59 = vand.u32 4294901760, %v633_v44  ;;  %v645_v63 = vsub.f32 %v1979_v9, %v2820_v48  ;;  %v2825_v0 = vand.u32 4294901760, %v2005_v49  ;;  %v2034_v7 = vsub.f32 %v1863_v28, %v1888_v37  ;;  %v2052_v28 = vld [vmem:[%s2811_s0 + $0x38] sm:$0xff] }
  0x28   : > { %2957 = vst [vmem:[#allocation15_spill] sm:$0xff] %v2025_v58  ;;  %494 = vmatpush1.msra.mxu0 %v1928_v51  ;;  %v640_v39 = vand.u32 4294901760, %v639_v54  ;;  %v651_v15 = vsub.f32 %v1993_v43, %v2822_v55  ;;  %v2827_v44 = vand.u32 4294901760, %v2022_v22  ;;  %v2047_v48 = vand.u32 4294901760, %v2013_v21 }
  0x29   : > { %635 = vmatpush1.msra.mxu1 %v634_v59  ;;  %496 = vmatprep.subr.mxu0 %v1953_v61  ;;  %v646_v8 = vand.u32 4294901760, %v645_v63  ;;  %v657_v54 = vsub.f32 %v2005_v49, %v2825_v0  ;;  %v2830_v55 = vand.u32 4294901760, %v2034_v7  ;;  %v2061_v56 = vsub.f32 %v1868_v29, %v1904_v42 }
  0x2a   : > { %2958 = vst [vmem:[#allocation16_spill] sm:$0xff] %v2047_v48  ;;  %641 = vmatprep.subr.mxu1 %v640_v39  ;;  %498 = vmatpush1.msra.mxu0 %v1968_v2  ;;  %v652_v59 = vand.u32 4294901760, %v651_v15  ;;  %v663_v63 = vsub.f32 %v2022_v22, %v2827_v44  ;;  %v2073_v0 = vand.u32 4294901760, %v2039_v27  ;;  %v2077_v29 = vsub.f32 %v1893_v38, %v1928_v51  ;;  %v2095_v38 = vld [vmem:[%s2811_s0 + $0x20] sm:$0xff] }
  0x2b   : > { %647 = vmatpush1.msra.mxu1 %v646_v8  ;;  %500 = vmatprep.subr.mxu0 %v1982_v13  ;;  %v658_v39 = vand.u32 4294901760, %v657_v54  ;;  %v669_v15 = vsub.f32 %v2034_v7, %v2830_v55  ;;  %v2835_v44 = vand.u32 4294901760, %v2061_v56  ;;  %v2090_v40 = vand.u32 4294901760, %v2052_v28 }
  0x2c   : > { %2959 = vst [vmem:[#allocation17_spill] sm:$0xff] %v2073_v0  ;;  %653 = vmatprep.subr.mxu1 %v652_v59  ;;  %502 = vmatpush1.msra.mxu0 %v1996_v20  ;;  %v664_v8 = vand.u32 4294901760, %v663_v63  ;;  %v2836_v54 = vand.u32 4294901760, %v2077_v29  ;;  %v2101_v35 = vsub.f32 %v1920_v47, %v1953_v61  ;;  %v2104_v55 = vand.u32 4294901760, %v2066_v50 }
  0x2d   : > { %2960 = vst [vmem:[#allocation18_spill] sm:$0xff] %v2090_v40  ;;  %659 = vmatpush1.msra.mxu1 %v658_v39  ;;  %504 = vmatprep.subr.mxu0 %v2008_v53  ;;  %v670_v59 = vand.u32 4294901760, %v669_v15  ;;  %v675_v63 = vsub.f32 %v2061_v56, %v2835_v44  ;;  %v2117_v47 = vsub.f32 %v1933_v52, %v1968_v2  ;;  %v2120_v30 = vand.u32 4294901760, %v2082_v45  ;;  %v2137_v52 = vld [vmem:[%s2811_s0 + $0x10] sm:$0xff] }
  0x2e   : > { %2961 = vst [vmem:[#allocation19_spill] sm:$0xff] %v2104_v55  ;;  %665 = vmatprep.subr.mxu1 %v664_v8  ;;  %506 = vmatpush1.msra.mxu0 %v2025_v58  ;;  %v681_v39 = vsub.f32 %v2077_v29, %v2836_v54  ;;  %v2129_v61 = vsub.f32 %v1943_v57, %v1982_v13  ;;  %v2132_v44 = vand.u32 4294901760, %v2095_v38  ;;  %v2146_v57 = vand.u32 4294901760, %v2109_v34  ;;  %v2151_v13 = vld [vmem:[%s2811_s0 + $0x8] sm:$0xff] }
  0x2f   : > { %2962 = vst [vmem:[#allocation20_spill] sm:$0xff] %v2117_v47  ;;  %2963 = vst [vmem:[#allocation21_spill] sm:$0xff] %v2120_v30  ;;  %671 = vmatpush1.msra.mxu1 %v670_v59  ;;  %508 = vmatprep.subr.mxu0 %v2047_v48  ;;  %v676_v8 = vand.u32 4294901760, %v675_v63  ;;  %v2143_v15 = vsub.f32 %v1958_v62, %v1996_v20  ;;  %v2968_v2 = vand.u32 4294901760, %v2101_v35  ;;  %v2970_v20 = vand.u32 4294901760, %v2117_v47 }
  0x30   : > { %2964 = vst [vmem:[#allocation22_spill] sm:$0xff] %v2129_v61  ;;  %2965 = vst [vmem:[#allocation23_spill] sm:$0xff] %v2132_v44  ;;  %510 = vmatpush1.msra.mxu0 %v2073_v0  ;;  %v682_v59 = vand.u32 4294901760, %v681_v39  ;;  %v2853_v54 = vand.u32 4294901760, %v2129_v61  ;;  %v2160_v62 = vsub.f32 %v1973_v3, %v2008_v53  ;;  %v2168_v39 = vand.u32 4294901760, %v2137_v52  ;;  %v2177_v3 = vld [vmem:[%s2811_s0] sm:$0xff] }
  0x31   : > { %2966 = vst [vmem:[#allocation24_spill] sm:$0xff] %v2143_v15  ;;  %2967 = vst [vmem:[#allocation25_spill] sm:$0xff] %v2146_v57  ;;  %v687_v63 = vsub.f32 %v2101_v35, %v2968_v2  ;;  %677 = vmatprep.subr.mxu1 %v676_v8  ;;  %512 = vmatprep.subr.mxu0 %v2090_v40  ;;  %v693_v51 = vsub.f32 %v2117_v47, %v2970_v20  ;;  %v2185_v53 = vand.u32 4294901760, %v2151_v13  ;;  %vm338_vm5 = vcmask 332800  }
  0x32   : > { %2969 = vst [vmem:[#allocation26_spill] sm:$0xff] %v2160_v62  ;;  %2971 = vst [vmem:[#allocation27_spill] sm:$0xff] %v2168_v39  ;;  %v2172_v2 = vsub.f32 %v1987_v14, %v2025_v58  ;;  %683 = vmatpush1.msra.mxu1 %v682_v59  ;;  %514 = vmatpush1.msra.mxu0 %v2104_v55  ;;  %v699_v20 = vsub.f32 %v2129_v61, %v2853_v54  ;;  %v451_v14 = vld [vmem:[%s2811_s0 + $0x158] sm:$0x1]  ;;  %v2974_v59 = vand.u32 4294901760, %v2143_v15  ;;  %vm352_vm6 = vcmask 0  }
  0x33   : > { %v688_v8 = vand.u32 4294901760, %v687_v63  ;;  %2973 = vst [vmem:[#allocation29_spill] sm:$0xff] %v2185_v53  ;;  %v694_v58 = vand.u32 4294901760, %v693_v51  ;;  %516 = vmatprep.subr.mxu0 %v2120_v30  ;;  %v2197_v54 = vsub.f32 %v2013_v21, %v2047_v48  ;;  %v2976_v61 = vand.u32 4294901760, %v2160_v62  ;;  %v450_v21 = vld [vmem:[%s2811_s0 + $0x150] sm:$0x1] }
  0x34   : > { %2972 = vst [vmem:[#allocation28_spill] sm:$0xff] %v2172_v2  ;;  %v705_v63 = vsub.f32 %v2143_v15, %v2974_v59  ;;  %v2862_v37 = vand.u32 4294901760, %v2172_v2  ;;  %v700_v42 = vand.u32 4294901760, %v699_v20  ;;  %518 = vmatpush1.msra.mxu0 %v2132_v44  ;;  %v2204_v47 = vand.u32 4294901760, %v2177_v3 }
  0x35   : > { %2975 = vst [vmem:[#allocation30_spill] sm:$0xff] %v2197_v54  ;;  %689 = vmatprep.subr.mxu1 %v688_v8  ;;  %v711_v51 = vsub.f32 %v2160_v62, %v2976_v61  ;;  %v2208_v59 = vsub.f32 %v2039_v27, %v2073_v0  ;;  %520 = vmatprep.subr.mxu0 %v2146_v57  ;;  %v2219_v48 = vsel %vm456_vm2, %v451_v14, 0  ;;  %v2224_v27 = vld [vmem:[%s2811_s0 + $0x148] sm:$0xff]  ;;  %v2238_v14 = vld [vmem:[%s2811_s0 + $0x140] sm:$0xff]  ;;  %vm1541_vm7 = vcmask 1045505  }
  0x36   : > { %2977 = vst [vmem:[#allocation31_spill] sm:$0xff] %v2204_v47  ;;  %695 = vmatpush1.msra.mxu1 %v694_v58  ;;  %v706_v8 = vand.u32 4294901760, %v705_v63  ;;  %v717_v20 = vsub.f32 %v2172_v2, %v2862_v37  ;;  %522 = vmatpush1.msra.mxu0 %v2168_v39  ;;  %v2229_v63 = vand.u32 4294901760, %v2219_v48  ;;  %v2233_v37 = vsub.f32 %v2052_v28, %v2090_v40  ;;  %v2254_v40 = vld [vmem:[%s2811_s0 + $0x138] sm:$0xff] }
  0x37   : > { %2978 = vst [vmem:[#allocation32_spill] sm:$0xff] %v2208_v59  ;;  %701 = vmatprep.subr.mxu1 %v700_v42  ;;  %v712_v0 = vand.u32 4294901760, %v711_v51  ;;  %524 = vmatprep.subr.mxu0 %v2185_v53  ;;  %v2981_v42 = vand.u32 4294901760, %v2197_v54  ;;  %v2245_v58 = vsel %vm456_vm2, %v450_v21, 0  ;;  %v2249_v28 = vsub.f32 %v2066_v50, %v2104_v55  ;;  %v2270_v55 = vld [vmem:[%s2811_s0 + $0x130] sm:$0xff] }
  0x38   : > { %2979 = vst [vmem:[#allocation33_spill] sm:$0xff] %v2229_v63  ;;  %2980 = vst [vmem:[#allocation34_spill] sm:$0xff] %v2233_v37  ;;  %707 = vmatpush1.msra.mxu1 %v706_v8  ;;  %v718_v61 = vand.u32 4294901760, %v717_v20  ;;  %526 = vmatpush1.msra.mxu0 %v2204_v47  ;;  %v2983_v8 = vand.u32 4294901760, %v2208_v59  ;;  %v2262_v21 = vand.u32 4294901760, %v2245_v58  ;;  %v2265_v50 = vand.u32 4294901760, %v2224_v27 }
  0x39   : > { %v723_v51 = vsub.f32 %v2197_v54, %v2981_v42  ;;  %2982 = vst [vmem:[#allocation35_spill] sm:$0xff] %v2249_v28  ;;  %713 = vmatprep.subr.mxu1 %v712_v0  ;;  %548 = vmatprep.subr.mxu0 %v2229_v63  ;;  %v2279_v42 = vand.u32 4294901760, %v2238_v14  ;;  %v2292_v54 = vsub.f32 %v2095_v38, %v2132_v44  ;;  %v2312_v38 = vld [vmem:[%s2811_s0 + $0x120] sm:$0xff]  ;;  %vm1543_vm8 = vcmask 332801  }
  0x3a   : > { %v729_v20 = vsub.f32 %v2208_v59, %v2983_v8  ;;  %2984 = vst [vmem:[#allocation36_spill] sm:$0xff] %v2262_v21  ;;  %2985 = vst [vmem:[#allocation37_spill] sm:$0xff] %v2265_v50  ;;  %719 = vmatpush1.msra.mxu1 %v718_v61  ;;  %v2276_v8 = vsub.f32 %v2082_v45, %v2120_v30  ;;  %v2284_v59 = vld [vmem:[%s2811_s0 + $0x128] sm:$0xff]  ;;  %v2988_v61 = vand.u32 4294901760, %v2233_v37  ;;  %550 = vmatpush2.msra.mxu0 %v2262_v21  ;;  %vm1552_vm9 = vcmask 4096  }
  0x3b   : > { %v724_v0 = vand.u32 4294901760, %v723_v51  ;;  %2987 = vst [vmem:[#allocation39_spill] sm:$0xff] %v2279_v42  ;;  %2989 = vst [vmem:[#allocation40_spill] sm:$0xff] %v2292_v54  ;;  %v2295_v45 = vand.u32 4294901760, %v2254_v40  ;;  %v2991_v30 = vand.u32 4294901760, %v2249_v28  ;;  %552 = vmatprep.subr.mxu0 %v2265_v50 }
  0x3c   : > { %2986 = vst [vmem:[#allocation38_spill] sm:$0xff] %v2276_v8  ;;  %v730_v2 = vand.u32 4294901760, %v729_v20  ;;  %v735_v51 = vsub.f32 %v2233_v37, %v2988_v61  ;;  %v2304_v61 = vsub.f32 %v2109_v34, %v2146_v57  ;;  %v2307_v37 = vand.u32 4294901760, %v2270_v55  ;;  %554 = vmatpush2.msra.mxu0 %v2279_v42  ;;  %v2326_v57 = vld [vmem:[%s2811_s0 + $0x118] sm:$0xff] }
  0x3d   : > { %2990 = vst [vmem:[#allocation41_spill] sm:$0xff] %v2295_v45  ;;  %725 = vmatprep.subr.mxu1 %v724_v0  ;;  %v741_v62 = vsub.f32 %v2249_v28, %v2991_v30  ;;  %v2318_v20 = vsub.f32 %v2137_v52, %v2168_v39  ;;  %v2321_v34 = vand.u32 4294901760, %v2284_v59  ;;  %556 = vmatprep.subr.mxu0 %v2295_v45  ;;  %v2998_v39 = vand.u32 4294901760, %v2292_v54 }
  0x3e   : > { %2992 = vst [vmem:[#allocation42_spill] sm:$0xff] %v2304_v61  ;;  %2993 = vst [vmem:[#allocation43_spill] sm:$0xff] %v2307_v37  ;;  %731 = vmatpush1.msra.mxu1 %v730_v2  ;;  %v736_v0 = vand.u32 4294901760, %v735_v51  ;;  %v2996_v2 = vand.u32 4294901760, %v2276_v8  ;;  %v2335_v52 = vsub.f32 %v2151_v13, %v2185_v53  ;;  %558 = vmatpush2.msra.mxu0 %v2307_v37  ;;  %v2352_v13 = vld [vmem:[%s2811_s0 + $0x110] sm:$0xff] }
  0x3f   : > { %2994 = vst [vmem:[#allocation44_spill] sm:$0xff] %v2318_v20  ;;  %2995 = vst [vmem:[#allocation45_spill] sm:$0xff] %v2321_v34  ;;  %v742_v44 = vand.u32 4294901760, %v741_v62  ;;  %v753_v28 = vsub.f32 %v2292_v54, %v2998_v39  ;;  %v2347_v30 = vsub.f32 %v2177_v3, %v2204_v47  ;;  %v2999_v39 = vand.u32 4294901760, %v2304_v61  ;;  %560 = vmatprep.subr.mxu0 %v2321_v34  ;;  %v2365_v3 = vld [vmem:[%s2811_s0 + $0x108] sm:$0xff] }
  0x40   : > { %v747_v51 = vsub.f32 %v2276_v8, %v2996_v2  ;;  %2997 = vst [vmem:[#allocation46_spill] sm:$0xff] %v2335_v52  ;;  %737 = vmatprep.subr.mxu1 %v736_v0  ;;  %v2343_v2 = vand.u32 4294901760, %v2312_v38  ;;  %v2360_v54 = vand.u32 4294901760, %v2326_v57  ;;  %v2374_v62 = vsub.f32 %v2219_v48, %v2229_v63 }
  0x41   : > { %743 = vmatpush1.msra.mxu1 %v742_v44  ;;  %v759_v53 = vsub.f32 %v2304_v61, %v2999_v39  ;;  %v754_v47 = vand.u32 4294901760, %v753_v28  ;;  %v3001_v44 = vand.u32 4294901760, %v2318_v20  ;;  %v2379_v61 = vld [vmem:[%s2811_s0 + $0x100] sm:$0xff]  ;;  %v3002_v8 = vand.u32 4294901760, %v2335_v52  ;;  %v2393_v39 = vld [vmem:[%s1775_s17 + $0x8] sm:$0x3f] }
  0x42   : > { %v748_v0 = vand.u32 4294901760, %v747_v51  ;;  %3000 = vst [vmem:[#allocation47_spill] sm:$0xff] %v2360_v54  ;;  %562 = vmatpush2.msra.mxu0 %v2343_v2  ;;  %v2390_v48 = vsub.f32 %v2245_v58, %v2262_v21  ;;  %3004 = vst [vmem:[#allocation49_spill] sm:$0xff] %v2393_v39  ;;  %v2909_v15 = vand.u32 4294901760, %v2374_v62 }
  0x43   : > { %v765_v51 = vsub.f32 %v2318_v20, %v3001_v44  ;;  %v760_v28 = vand.u32 4294901760, %v759_v53  ;;  %v771_v44 = vsub.f32 %v2335_v52, %v3002_v8  ;;  %564 = vmatprep.subr.mxu0 %v2360_v54  ;;  %v2386_v20 = vand.u32 4294901760, %v2352_v13  ;;  %v2403_v52 = vld [vmem:[%s1775_s17] sm:$0x3f] }
  0x44   : > { %749 = vmatprep.subr.mxu1 %v748_v0  ;;  %v3005_v0 = vand.u32 4294901760, %v2347_v30  ;;  %v2400_v8 = vand.u32 4294901760, %v2365_v3  ;;  %3007 = vst [vmem:[#allocation51_spill] sm:$0xff] %v2403_v52  ;;  %v2913_v58 = vand.u32 4294901760, %v2390_v48  ;;  %v803_v21 = vsub.f32 %v2374_v62, %v2909_v15 }
  0x45   : > { %3003 = vst [vmem:[#allocation48_spill] sm:$0xff] %v2386_v20  ;;  %755 = vmatpush1.msra.mxu1 %v754_v47  ;;  %v766_v63 = vand.u32 4294901760, %v765_v51  ;;  %v772_v33 = vand.u32 4294901760, %v771_v44  ;;  %566 = vmatpush2.msra.mxu0 %v2386_v20  ;;  %v2409_v47 = vsub.f32 %v2224_v27, %v2265_v50  ;;  %v2412_v51 = vand.u32 4294901760, %v2379_v61 }
  0x46   : > { %v777_v53 = vsub.f32 %v2347_v30, %v3005_v0  ;;  %3006 = vst [vmem:[#allocation50_spill] sm:$0xff] %v2400_v8  ;;  %761 = vmatprep.subr.mxu1 %v760_v28  ;;  %568 = vmatprep.subr.mxu0 %v2400_v8  ;;  %v2420_v28 = vsub.f32 %v2238_v14, %v2279_v42  ;;  %v359_v44 = vmul.f32 40.0, %v2393_v39  ;;  %v358_v15 = vmul.f32 40.0, %v2403_v52 }
  0x47   : > { %3008 = vst [vmem:[#allocation52_spill] sm:$0xff] %v2412_v51  ;;  %767 = vmatpush1.msra.mxu1 %v766_v63  ;;  %v809_v27 = vsub.f32 %v2390_v48, %v2913_v58  ;;  %v2917_v63 = vand.u32 4294901760, %v2409_v47  ;;  %570 = vmatpush2.msra.mxu0 %v2412_v51  ;;  %v804_v14 = vand.u32 4294901760, %v803_v21 }
  0x48   : > { %v778_v0 = vand.u32 4294901760, %v777_v53  ;;  %773 = vmatprep.subr.mxu1 %v772_v33  ;;  %v2430_v53 = vsub.f32 %v2254_v40, %v2295_v45  ;;  %v2918_v42 = vand.u32 4294901760, %v2420_v28  ;;  %v2434_v39 = vadd.f32 300.0, %v359_v44  ;;  %883 = vmatprep.subr.mxu0 %v1825_v19 }
  0x49   : > { %v2439_v33 = vsub.f32 %v2270_v55, %v2307_v37  ;;  %v810_v58 = vand.u32 4294901760, %v809_v27  ;;  %v815_v40 = vsub.f32 %v2409_v47, %v2917_v63  ;;  %v2445_v52 = vadd.f32 300.0, %v358_v15 }
  0x4a   : > { %779 = vmatpush1.msra.mxu1 %v778_v0  ;;  %3009 = vst [vmem:[#allocation53_spill] sm:$0xff] %v2434_v39  ;;  %v2922_v45 = vand.u32 4294901760, %v2430_v53  ;;  %v821_v21 = vsub.f32 %v2420_v28, %v2918_v42  ;;  %v454_v0 = vsel %vm452_vm3, %v2434_v39, 0  ;;  %v2455_v44 = vsub.f32 %v2284_v59, %v2321_v34 }
  0x4b   : > { %3010 = vst [vmem:[#allocation54_spill] sm:$0xff] %v2445_v52  ;;  %805 = vmatprep.subr.mxu1 %v804_v14  ;;  %v2923_v55 = vand.u32 4294901760, %v2439_v33  ;;  %v816_v27 = vand.u32 4294901760, %v815_v40  ;;  %v2457_v63 = vand.u32 4294901760, %v454_v0  ;;  %v2463_v14 = vand.u32 4294901760, %v2445_v52 }
  0x4c   : > { %811 = vmatpush2.msra.mxu1 %v810_v58  ;;  %v827_v15 = vsub.f32 %v2430_v53, %v2922_v45  ;;  %v822_v42 = vand.u32 4294901760, %v821_v21  ;;  %v2926_v19 = vand.u32 4294901760, %v2455_v44  ;;  %v2471_v59 = vsub.f32 %v2312_v38, %v2343_v2 }
  0x4d   : > { %3011 = vst [vmem:[#allocation55_spill] sm:$0xff] %v2457_v63  ;;  %3012 = vst [vmem:[#allocation56_spill] sm:$0xff] %v2463_v14  ;;  %v833_v39 = vsub.f32 %v2439_v33, %v2923_v55  ;;  %817 = vmatprep.subr.mxu1 %v816_v27  ;;  %v2474_v58 = vsub.f32 %v454_v0, %v2457_v63  ;;  %v2478_v45 = vsub.f32 %v2445_v52, %v2463_v14 }
  0x4e   : > { %v828_v40 = vand.u32 4294901760, %v827_v15  ;;  %v2482_v21 = vsub.f32 %v2326_v57, %v2360_v54  ;;  %873 = vmatprep.mubr.f32.mxu1 %v2457_v63  ;;  %823 = vmatpush2.msra.mxu1 %v822_v42  ;;  %v839_v38 = vsub.f32 %v2455_v44, %v2926_v19  ;;  %v2927_v0 = vand.u32 4294901760, %v2471_v59 }
  0x4f   : > { %v834_v55 = vand.u32 4294901760, %v833_v39  ;;  %v2491_v27 = vsub.f32 %v2352_v13, %v2386_v20  ;;  %v2936_v57 = vand.u32 4294901760, %v2478_v45  ;;  %v2498_v42 = vsub.f32 %v2365_v3, %v2400_v8 }
  0x50   : > { %829 = vmatprep.subr.mxu1 %v828_v40  ;;  %v840_v39 = vand.u32 4294901760, %v839_v38  ;;  %v845_v19 = vsub.f32 %v2471_v59, %v2927_v0  ;;  %v2506_v15 = vsub.f32 %v2379_v61, %v2412_v51  ;;  %v3014_v40 = vand.u32 4294901760, %v2474_v58 }
  0x51   : > { %835 = vmatpush2.msra.mxu1 %v834_v55  ;;  %v580_v3 = vsub.f32 %v2478_v45, %v2936_v57  ;;  %v3015_v55 = vand.u32 4294901760, %v2482_v21  ;;  %v2940_v0 = vand.u32 4294901760, %v2498_v42  ;;  %v3016_v63 = vand.u32 4294901760, %v2491_v27 }
  0x52   : > { %3013 = vst [vmem:[#allocation57_spill] sm:$0xff] %v2506_v15  ;;  %v574_v52 = vsub.f32 %v2474_v58, %v3014_v40  ;;  %841 = vmatprep.subr.mxu1 %v840_v39  ;;  %v846_v13 = vand.u32 4294901760, %v845_v19  ;;  %v2939_v51 = vand.u32 4294901760, %v2506_v15 }
  0x53   : > { %v851_v38 = vsub.f32 %v2482_v21, %v3015_v55  ;;  %v857_v61 = vsub.f32 %v2491_v27, %v3016_v63  ;;  %v581_v40 = vand.u32 4294901760, %v580_v3  ;;  %v863_v57 = vsub.f32 %v2498_v42, %v2940_v0  ;;  %v3023_v3 = vld [vmem:[#allocation9_spill] sm:$0xff]  ;;  %v3024_v55 = vld [vmem:[#allocation26_spill] sm:$0xff] }
  0x54   : > { %v575_v8 = vand.u32 4294901760, %v574_v52  ;;  %847 = vmatpush2.msra.mxu1 %v846_v13  ;;  %v869_v39 = vsub.f32 %v2506_v15, %v2939_v51  ;;  %v3019_v52 = vld [vmem:[#allocation7_spill] sm:$0xff]  ;;  %v3022_v13 = vld [vmem:[#allocation24_spill] sm:$0xff]  ;;  %v3031_v51 = vld [vmem:[#allocation13_spill] sm:$0xff] }
  0x55   : > { %v852_v20 = vand.u32 4294901760, %v851_v38  ;;  %v858_v54 = vand.u32 4294901760, %v857_v61  ;;  %v864_v19 = vand.u32 4294901760, %v863_v57  ;;  %v3021_v57 = vld [vmem:[#allocation8_spill] sm:$0xff]  ;;  %v3025_v38 = vld [vmem:[#allocation10_spill] sm:$0xff] }
  0x56   : > { %576 = vmatprep.mubr.f32.mxu0 %v575_v8  ;;  %v870_v63 = vand.u32 4294901760, %v869_v39  ;;  %v3020_v8 = vld [vmem:[#allocation22_spill] sm:$0xff]  ;;  %v3026_v61 = vld [vmem:[#allocation28_spill] sm:$0xff] }
  0x57   : > { %853 = vmatprep.subr.mxu1 %v852_v20  ;;  %582 = vmatmul.mubr.f32.vlgmr.msra.gmra.mxu0 %v581_v40  ;;  %v3018_v20 = vld [vmem:[#allocation20_spill] sm:$0xff]  ;;  %v3027_v40 = vld [vmem:[#allocation11_spill] sm:$0xff]  ;;  %v3028_v39 = vld [vmem:[#allocation30_spill] sm:$0xff] }
  0x58   : > { %859 = vmatpush2.msra.mxu1 %v858_v54  ;;  %886 = vmatpush1.msra.mxu0 %v1847_v24  ;;  %v3017_v54 = vld [vmem:[#allocation6_spill] sm:$0xff] }
  0x59   : > { %865 = vmatprep.subr.mxu1 %v864_v19  ;;  %889 = vmatprep.subr.mxu0 %v1853_v26  ;;  %v3029_v19 = vld [vmem:[#allocation12_spill] sm:$0xff]  ;;  %v3032_v0 = vld [vmem:[#allocation34_spill] sm:$0xff] }
  0x5a   : > { %871 = vmatpush2.msra.mxu1 %v870_v63  ;;  %892 = vmatpush1.msra.mxu0 %v1876_v32  ;;  %v3030_v63 = vld [vmem:[#allocation32_spill] sm:$0xff] }
  0x5b   : > { %875 = vmatmul.mubr.f32.vlgmr.msra.gmra.mxu1 %v2463_v14  ;;  %895 = vmatprep.subr.mxu0 %v1885_v36  ;;  %v3033_v14 = vld [vmem:[#allocation14_spill] sm:$0xff] }
  0x5c   : > { %1045 = vmatprep.subr.mxu1 %v1787_v4  ;;  %898 = vmatpush1.msra.mxu0 %v1901_v41 }
  0x5d   : > { %1047 = vmatpush1.msra.mxu1 %v1789_v5  ;;  %901 = vmatprep.subr.mxu0 %v1915_v46 }
  0x5e   : > { %1049 = vmatprep.subr.mxu1 %v1791_v6  ;;  %904 = vmatpush1.msra.mxu0 %v1950_v60 }
  0x5f   : > { %1051 = vmatpush1.msra.mxu1 %v1802_v10  ;;  %907 = vmatprep.subr.mxu0 %v1965_v1 }
  0x60   : > { %1053 = vmatprep.subr.mxu1 %v1804_v11  ;;  %910 = vmatpush1.msra.mxu0 %v1979_v9 }
  0x61   : > { %1055 = vmatpush1.msra.mxu1 %v1806_v12  ;;  %913 = vmatprep.subr.mxu0 %v1993_v43 }
  0x62   : > { %1057 = vmatprep.subr.mxu1 %v1818_v16  ;;  %916 = vmatpush1.msra.mxu0 %v2005_v49 }
  0x63   : > { %1059 = vmatpush1.msra.mxu1 %v1820_v17  ;;  %919 = vmatprep.subr.mxu0 %v2022_v22 }
  0x64   : > { %1061 = vmatprep.subr.mxu1 %v1822_v18  ;;  %922 = vmatpush1.msra.mxu0 %v2034_v7 }
  0x65   : > { %1063 = vmatpush1.msra.mxu1 %v1844_v23  ;;  %925 = vmatprep.subr.mxu0 %v2061_v56 }
  0x66   : > { %1065 = vmatprep.subr.mxu1 %v1850_v25  ;;  %928 = vmatpush1.msra.mxu0 %v2077_v29 }
  0x67   : > { %1067 = vmatpush1.msra.mxu1 %v1873_v31  ;;  %931 = vmatprep.subr.mxu0 %v2101_v35 }
  0x68   : > { %1069 = vmatprep.subr.mxu1 %v3017_v54  ;;  %934 = vmatpush1.msra.mxu0 %v3018_v20 }
  0x69   : > { %1071 = vmatpush1.msra.mxu1 %v3019_v52  ;;  %937 = vmatprep.subr.mxu0 %v3020_v8  ;;  %v3037_v52 = vld [vmem:[#allocation16_spill] sm:$0xff] }
  0x6a   : > { %1073 = vmatprep.subr.mxu1 %v3021_v57  ;;  %940 = vmatpush1.msra.mxu0 %v3022_v13  ;;  %v3035_v57 = vld [vmem:[#allocation15_spill] sm:$0xff] }
  0x6b   : > { %1075 = vmatpush1.msra.mxu1 %v3023_v3  ;;  %943 = vmatprep.subr.mxu0 %v3024_v55  ;;  %v3034_v3 = vld [vmem:[#allocation35_spill] sm:$0xff] }
  0x6c   : > { %1077 = vmatprep.subr.mxu1 %v3025_v38  ;;  %946 = vmatpush1.msra.mxu0 %v3026_v61  ;;  %v3036_v38 = vld [vmem:[#allocation38_spill] sm:$0xff] }
  0x6d   : > { %1079 = vmatpush1.msra.mxu1 %v3027_v40  ;;  %949 = vmatprep.subr.mxu0 %v3028_v39  ;;  %v3038_v40 = vld [vmem:[#allocation40_spill] sm:$0xff]  ;;  %v3039_v39 = vld [vmem:[#allocation17_spill] sm:$0xff] }
  0x6e   : > { %1081 = vmatprep.subr.mxu1 %v3029_v19  ;;  %952 = vmatpush1.msra.mxu0 %v3030_v63  ;;  %v3040_v19 = vld [vmem:[#allocation42_spill] sm:$0xff] }
  0x6f   : > { %1083 = vmatpush1.msra.mxu1 %v3031_v51  ;;  %955 = vmatprep.subr.mxu0 %v3032_v0  ;;  %v3041_v63 = vld [vmem:[#allocation18_spill] sm:$0xff]  ;;  %v3042_v51 = vld [vmem:[#allocation44_spill] sm:$0xff]  ;;  %v3043_v0 = vld [vmem:[#allocation19_spill] sm:$0xff] }
  0x70   : > { %1085 = vmatprep.subr.mxu1 %v3033_v14  ;;  %958 = vmatpush1.msra.mxu0 %v3034_v3  ;;  %v3044_v14 = vld [vmem:[#allocation46_spill] sm:$0xff]  ;;  %v3045_v3 = vld [vmem:[#allocation21_spill] sm:$0xff] }
  0x71   : > { %1087 = vmatpush1.msra.mxu1 %v3035_v57  ;;  %961 = vmatprep.subr.mxu0 %v3036_v38  ;;  %v3046_v57 = vld [vmem:[#allocation23_spill] sm:$0xff] }
  0x72   : > { %1089 = vmatprep.subr.mxu1 %v3037_v52  ;;  %964 = vmatpush1.msra.mxu0 %v3038_v40  ;;  %v3047_v52 = vld [vmem:[#allocation25_spill] sm:$0xff] }
  0x73   : > { %1091 = vmatpush1.msra.mxu1 %v3039_v39  ;;  %967 = vmatprep.subr.mxu0 %v3040_v19  ;;  %v3048_v39 = vld [vmem:[#allocation27_spill] sm:$0xff] }
  0x74   : > { %1093 = vmatprep.subr.mxu1 %v3041_v63  ;;  %970 = vmatpush1.msra.mxu0 %v3042_v51  ;;  %v3049_v63 = vld [vmem:[#allocation29_spill] sm:$0xff] }
  0x75   : > { %1095 = vmatpush1.msra.mxu1 %v3043_v0  ;;  %973 = vmatprep.subr.mxu0 %v3044_v14  ;;  %v3050_v0 = vld [vmem:[#allocation31_spill] sm:$0xff] }
  0x76   : > { %1097 = vmatprep.subr.mxu1 %v3045_v3  ;;  %976 = vmatpush1.msra.mxu0 %v2347_v30  ;;  %v3051_v3 = vld [vmem:[#allocation33_spill] sm:$0xff] }
  0x77   : > { %1099 = vmatpush1.msra.mxu1 %v3046_v57  ;;  %999 = vmatprep.subr.mxu0 %v2374_v62  ;;  %v3052_v57 = vld [vmem:[#allocation36_spill] sm:$0xff] }
  0x78   : > { %1101 = vmatprep.subr.mxu1 %v3047_v52  ;;  %1002 = vmatpush2.msra.mxu0 %v2390_v48 }
  0x79   : > { %1103 = vmatpush1.msra.mxu1 %v3048_v39  ;;  %1005 = vmatprep.subr.mxu0 %v2409_v47 }
  0x7a   : > { %1105 = vmatprep.subr.mxu1 %v3049_v63  ;;  %1008 = vmatpush2.msra.mxu0 %v2420_v28  ;;  %v3053_v63 = vld [vmem:[#allocation39_spill] sm:$0xff] }
  0x7b   : > { %1107 = vmatpush1.msra.mxu1 %v3050_v0  ;;  %1011 = vmatprep.subr.mxu0 %v2430_v53  ;;  %v3054_v0 = vld [vmem:[#allocation41_spill] sm:$0xff] }
  0x7c   : > { %1129 = vmatprep.subr.mxu1 %v3051_v3  ;;  %1014 = vmatpush2.msra.mxu0 %v2439_v33  ;;  %v3057_v3 = vand.u32 4294901760, %v1847_v24  ;;  %v3064_v24 = vand.u32 4294901760, %v1901_v41  ;;  %v3071_v41 = vand.u32 4294901760, %v1979_v9  ;;  %v3087_v9 = vld [vmem:[#allocation8_spill] sm:$0xff] }
  0x7d   : > { %1131 = vmatpush2.msra.mxu1 %v3052_v57  ;;  %1017 = vmatprep.subr.mxu0 %v2455_v44 }
  0x7e   : > { %1133 = vmatprep.subr.mxu1 %v2265_v50  ;;  %1020 = vmatpush2.msra.mxu0 %v2471_v59  ;;  %v3055_v50 = vld [vmem:[#allocation5_spill] sm:$0xff] }
  0x7f   : > { %1035 = vmatprep.mubr.f32.mxu0 %v2474_v58  ;;  %1023 = vmatprep.subr.mxu0 %v2482_v21  ;;  %v3056_v57 = vand.u32 4294901760, %v3055_v50  ;;  %v3063_v50 = vld [vmem:[#allocation50_spill] sm:$0xff] }
  0x80   : > { %1135 = vmatpush2.msra.mxu1 %v3053_v63  ;;  %1026 = vmatpush2.msra.mxu0 %v2491_v27  ;;  %v3059_v63 = vld [vmem:[#allocation47_spill] sm:$0xff] }
  0x81   : > { %1137 = vmatprep.subr.mxu1 %v3054_v0  ;;  %1029 = vmatprep.subr.mxu0 %v2498_v42  ;;  %v3058_v0 = vand.u32 4294901760, %v1853_v26  ;;  %v3066_v26 = vand.u32 4294901760, %v1915_v46  ;;  %v3072_v46 = vand.u32 4294901760, %v1993_v43 }
  0x82   : > { %1139 = vmatpush2.msra.mxu1 %v2307_v37  ;;  %1032 = vmatpush2.msra.mxu0 %v2506_v15  ;;  %v3060_v37 = vand.u32 4294901760, %v1876_v32  ;;  %v3061_v15 = vld [vmem:[#allocation48_spill] sm:$0xff]  ;;  %v3068_v32 = vand.u32 4294901760, %v1950_v60  ;;  %v3073_v60 = vand.u32 4294901760, %v2005_v49  ;;  %v3090_v49 = vld [vmem:[#allocation9_spill] sm:$0xff] }
  0x83   : > { %1141 = vmatprep.subr.mxu1 %v2321_v34  ;;  %1038 = vmatmul.mubr.f32.vlgmr.msra.gmra.mxu0 %v2478_v45  ;;  %v3062_v34 = vand.u32 4294901760, %v1885_v36  ;;  %v3070_v36 = vand.u32 4294901760, %v1965_v1  ;;  %v3074_v1 = vand.u32 4294901760, %v2022_v22 }
  0x84   : > { %1168 = vmatprep.subr.mxu0 %v3056_v57  ;;  %1143 = vmatpush2.msra.mxu1 %v2343_v2  ;;  %v3065_v57 = vld [vmem:[#allocation52_spill] sm:$0xff] }
  0x85   : > { %1172 = vmatpush1.msra.mxu0 %v3057_v3  ;;  %1145 = vmatprep.subr.mxu1 %v3059_v63  ;;  %v3102_v3 = vld [vmem:[#allocation14_spill] sm:$0xff] }
  0x86   : > { %1176 = vmatprep.subr.mxu0 %v3058_v0  ;;  %1147 = vmatpush2.msra.mxu1 %v3061_v15  ;;  %v3067_v0 = vand.u32 4294901760, %v2474_v58  ;;  %v3097_v58 = vand.u32 4294901760, %v3036_v38  ;;  %v3105_v38 = vand.u32 4294901760, %v3044_v14  ;;  %v3113_v14 = vand.u32 4294901760, %v2390_v48 }
  0x87   : > { %1180 = vmatpush1.msra.mxu0 %v3060_v37  ;;  %1149 = vmatprep.subr.mxu1 %v3063_v50  ;;  %v3069_v37 = vand.u32 4294901760, %v2478_v45  ;;  %v3120_v48 = vand.u32 4294901760, %v2439_v33  ;;  %v3126_v33 = vld [vmem:[#allocation33_spill] sm:$0xff] }
  0x88   : > { %1184 = vmatprep.subr.mxu0 %v3062_v34  ;;  %1151 = vmatpush2.msra.mxu1 %v3065_v57  ;;  %v3096_v34 = vld [vmem:[#allocation11_spill] sm:$0xff] }
  0x89   : > { %1188 = vmatpush1.msra.mxu0 %v3064_v24  ;;  %1155 = vmatprep.mubr.f32.mxu1 %v3067_v0  ;;  %v3106_v24 = vld [vmem:[#allocation16_spill] sm:$0xff]  ;;  %v3107_v0 = vand.u32 4294901760, %v2347_v30  ;;  %v3116_v30 = vld [vmem:[#allocation21_spill] sm:$0xff] }
  0x8a   : > { %1192 = vmatprep.subr.mxu0 %v3066_v26  ;;  %1159 = vmatmul.mubr.f32.vlgmr.msra.gmra.mxu1 %v3069_v37  ;;  %v327_v26 = vld [vmem:[%s1770_s14] sm:$0x3f] }
  0x8b   : > { %1196 = vmatpush1.msra.mxu0 %v3068_v32  ;;  %1371 = vmatprep.subr.mxu1 %v1787_v4  ;;  %v3075_v4 = vand.u32 4294901760, %v2034_v7  ;;  %v3093_v7 = vld [vmem:[#allocation10_spill] sm:$0xff]  ;;  %v3108_v32 = vld [vmem:[#allocation17_spill] sm:$0xff] }
  0x8c   : > { %1200 = vmatprep.subr.mxu0 %v3070_v36  ;;  %1373 = vmatpush1.msra.mxu1 %v1789_v5  ;;  %v3076_v5 = vand.u32 4294901760, %v2061_v56  ;;  %v3110_v36 = vld [vmem:[#allocation49_spill] sm:$0xff] }
  0x8d   : > { %1204 = vmatpush1.msra.mxu0 %v3071_v41  ;;  %1375 = vmatprep.subr.mxu1 %v1791_v6  ;;  %v3077_v6 = vand.u32 4294901760, %v2077_v29  ;;  %v3094_v29 = vld [vmem:[#allocation35_spill] sm:$0xff] }
  0x8e   : > { %1208 = vmatprep.subr.mxu0 %v3072_v46  ;;  %1377 = vmatpush1.msra.mxu1 %v1802_v10  ;;  %v3078_v10 = vand.u32 4294901760, %v2101_v35  ;;  %v3084_v35 = vld [vmem:[#allocation7_spill] sm:$0xff]  ;;  %v3095_v45 = vand.u32 4294901760, %v3094_v29  ;;  %v3112_v46 = vld [vmem:[#allocation18_spill] sm:$0xff] }
  0x8f   : > { %1212 = vmatpush1.msra.mxu0 %v3073_v60  ;;  %1379 = vmatprep.subr.mxu1 %v1804_v11  ;;  %v3079_v11 = vand.u32 4294901760, %v3018_v20  ;;  %v3099_v20 = vand.u32 4294901760, %v3038_v40  ;;  %v328_v40 = vld [vmem:[%s1770_s14 + $0x8] sm:$0x3f]  ;;  %v3114_v60 = vld [vmem:[#allocation19_spill] sm:$0xff] }
  0x90   : > { %1216 = vmatprep.subr.mxu0 %v3074_v1  ;;  %1381 = vmatpush1.msra.mxu1 %v1806_v12  ;;  %v3080_v12 = vand.u32 4294901760, %v3020_v8  ;;  %v3100_v8 = vld [vmem:[#allocation13_spill] sm:$0xff]  ;;  %v332_v41 = vsub.f32 %v328_v40, %v3110_v36  ;;  %v3115_v1 = vand.u32 4294901760, %v2409_v47  ;;  %v3121_v47 = vand.u32 4294901760, %v2455_v44  ;;  %v3128_v44 = vld [vmem:[#allocation36_spill] sm:$0xff] }
  0x91   : > { %1220 = vmatpush1.msra.mxu0 %v3075_v4  ;;  %1383 = vmatprep.subr.mxu1 %v1818_v16  ;;  %v3081_v16 = vand.u32 4294901760, %v3022_v13  ;;  %v3101_v13 = vand.u32 4294901760, %v3040_v19  ;;  %v3109_v19 = vld [vmem:[#allocation51_spill] sm:$0xff]  ;;  %v3117_v4 = vand.u32 4294901760, %v2420_v28  ;;  %v3122_v28 = vld [vmem:[#allocation29_spill] sm:$0xff] }
  0x92   : > { %1224 = vmatprep.subr.mxu0 %v3076_v5  ;;  %1385 = vmatpush1.msra.mxu1 %v1820_v17  ;;  %v3082_v17 = vand.u32 4294901760, %v3024_v55  ;;  %v3103_v55 = vand.u32 4294901760, %v3042_v51  ;;  %v331_v37 = vsub.f32 %v327_v26, %v3109_v19  ;;  %v3111_v51 = vand.u32 4294901760, %v2374_v62  ;;  %v3118_v5 = vld [vmem:[#allocation23_spill] sm:$0xff] }
  0x93   : > { %1228 = vmatpush1.msra.mxu0 %v3077_v6  ;;  %1387 = vmatprep.subr.mxu1 %v1822_v18  ;;  %v3083_v18 = vand.u32 4294901760, %v3026_v61  ;;  %v3104_v61 = vld [vmem:[#allocation15_spill] sm:$0xff]  ;;  %v335_v62 = vmul.f32 %v332_v41, %v332_v41 }
  0x94   : > { %1232 = vmatprep.subr.mxu0 %v3078_v10  ;;  %1389 = vmatpush1.msra.mxu1 %v1844_v23  ;;  %v3085_v23 = vld [vmem:[#allocation30_spill] sm:$0xff]  ;;  %v334_v6 = vmul.f32 %v331_v37, %v331_v37  ;;  %v3119_v10 = vand.u32 4294901760, %v2430_v53 }
  0x95   : > { %1236 = vmatpush1.msra.mxu0 %v3079_v11  ;;  %1391 = vmatprep.subr.mxu1 %v1850_v25  ;;  %v3086_v56 = vand.u32 4294901760, %v3085_v23  ;;  %v3088_v25 = vld [vmem:[#allocation32_spill] sm:$0xff]  ;;  %v3123_v11 = vand.u32 4294901760, %v2471_v59  ;;  %v3130_v59 = vld [vmem:[#allocation37_spill] sm:$0xff] }
  0x96   : > { %1240 = vmatprep.subr.mxu0 %v3080_v12  ;;  %1393 = vmatpush1.msra.mxu1 %v1873_v31  ;;  %v3089_v43 = vand.u32 4294901760, %v3088_v25  ;;  %v3091_v31 = vld [vmem:[#allocation34_spill] sm:$0xff]  ;;  %v3124_v12 = vld [vmem:[#allocation31_spill] sm:$0xff]  ;;  %v337_v53 = vsel %vm336_vm4, %v334_v6, 0.0  ;;  %v3136_v25 = vld [vmem:[#allocation41_spill] sm:$0xff] }
  0x97   : > { %1244 = vmatpush1.msra.mxu0 %v3081_v16  ;;  %1395 = vmatprep.subr.mxu1 %v3017_v54  ;;  %v3092_v22 = vand.u32 4294901760, %v3091_v31  ;;  %v3098_v54 = vld [vmem:[#allocation12_spill] sm:$0xff]  ;;  %v3125_v16 = vand.u32 4294901760, %v2482_v21  ;;  %v3134_v21 = vld [vmem:[#allocation39_spill] sm:$0xff]  ;;  %v364_v31 = vlaneseq }
  0x98   : > { %1248 = vmatprep.subr.mxu0 %v3082_v17  ;;  %1397 = vmatpush1.msra.mxu1 %v3084_v35  ;;  %v3129_v17 = vand.u32 4294901760, %v2498_v42  ;;  %v3131_v35 = vld [vmem:[#allocation57_spill] sm:$0xff] }
  0x99   : > { %1252 = vmatpush1.msra.mxu0 %v3083_v18  ;;  %1399 = vmatprep.subr.mxu1 %v3087_v9  ;;  %v3132_v23 = vand.u32 4294901760, %v3131_v35  ;;  %v3135_v9 = vld [vmem:[#allocation56_spill] sm:$0xff]  ;;  %v3138_v42 = vld [vmem:[#allocation45_spill] sm:$0xff] }
  0x9a   : > { %1256 = vmatprep.subr.mxu0 %v3086_v56  ;;  %1401 = vmatpush1.msra.mxu1 %v3090_v49  ;;  %v3133_v56 = vld [vmem:[#allocation55_spill] sm:$0xff]  ;;  %v355_v49 = vmul.f32 40.0, %v328_v40 }
  0x9b   : > { %1260 = vmatpush1.msra.mxu0 %v3089_v43  ;;  %1403 = vmatprep.subr.mxu1 %v3093_v7  ;;  %v354_v43 = vmul.f32 40.0, %v327_v26 }
  0x9c   : > { %1264 = vmatprep.subr.mxu0 %v3092_v22  ;;  %1405 = vmatpush1.msra.mxu1 %v3096_v34  ;;  %v365_v22 = vshrl.u32 %v364_v31, 7  ;;  %v2767_v29 = vadd.f32 300.0, %v355_v49 }
  0x9d   : > { %1268 = vmatpush1.msra.mxu0 %v3095_v45  ;;  %1407 = vmatprep.subr.mxu1 %v3098_v54  ;;  %v2765_v7 = vadd.f32 300.0, %v354_v43 }
  0x9e   : > { %1272 = vmatprep.subr.mxu0 %v3097_v58  ;;  %1409 = vmatpush1.msra.mxu1 %v3100_v8  ;;  %v379_v58 = vld [vmem:[%s2813_s2] sm:$0x3] }
  0x9f   : > { %1276 = vmatpush1.msra.mxu0 %v3099_v20  ;;  %1411 = vmatprep.subr.mxu1 %v3102_v3 }
  0xa0   : > { %1280 = vmatprep.subr.mxu0 %v3101_v13  ;;  %1413 = vmatpush1.msra.mxu1 %v3104_v61 }
  0xa1   : > { %1284 = vmatpush1.msra.mxu0 %v3103_v55  ;;  %1415 = vmatprep.subr.mxu1 %v3106_v24 }
  0xa2   : > { %1288 = vmatprep.subr.mxu0 %v3105_v38  ;;  %1417 = vmatpush1.msra.mxu1 %v3108_v32 }
  0xa3   : > { %1292 = vmatpush1.msra.mxu0 %v3107_v0  ;;  %1419 = vmatprep.subr.mxu1 %v3112_v46 }
  0xa4   : > { %1316 = vmatprep.subr.mxu0 %v3111_v51  ;;  %1421 = vmatpush1.msra.mxu1 %v3114_v60 }
  0xa5   : > { %1320 = vmatpush2.msra.mxu0 %v3113_v14  ;;  %1423 = vmatprep.subr.mxu1 %v3116_v30 }
  0xa6   : > { %1324 = vmatprep.subr.mxu0 %v3115_v1  ;;  %1425 = vmatpush1.msra.mxu1 %v3118_v5 }
  0xa7   : > { %1328 = vmatpush2.msra.mxu0 %v3117_v4  ;;  %1427 = vmatprep.subr.mxu1 %v3047_v52  ;;  %v339_v52 = vsel %vm338_vm5, %v335_v62, 0.0 }
  0xa8   : > { %1332 = vmatprep.subr.mxu0 %v3119_v10  ;;  %1429 = vmatpush1.msra.mxu1 %v3048_v39  ;;  %v3127_v39 = vand.u32 4294901760, %v2491_v27  ;;  %v340_v18 = vadd.f32 %v339_v52, %v337_v53  ;;  %v3137_v27 = vld [vmem:[#allocation43_spill] sm:$0xff] }
  0xa9   : > { %1336 = vmatpush2.msra.mxu0 %v3120_v48  ;;  %1431 = vmatprep.subr.mxu1 %v3122_v28  ;;  %v3139_v28 = vld [vmem:[#allocation54_spill] sm:$0xff]  ;;  %v1489_v53 = vld [vmem:[%s2812_s1] sm:$0x3] }
  0xaa   : > { %1340 = vmatprep.subr.mxu0 %v3121_v47  ;;  %1433 = vmatpush1.msra.mxu1 %v3124_v12 }
  0xab   : > { %1344 = vmatpush2.msra.mxu0 %v3123_v11  ;;  %1455 = vmatprep.subr.mxu1 %v3126_v33  ;;  %v1487_v11 = vmul.f32 %v3139_v28, %v3139_v28 }
  0xac   : > { %1348 = vmatprep.subr.mxu0 %v3125_v16  ;;  %1457 = vmatpush2.msra.mxu1 %v3128_v44  ;;  %v3140_v16 = vld [vmem:[#allocation53_spill] sm:$0xff] }
  0xad   : > { %1352 = vmatpush2.msra.mxu0 %v3127_v39  ;;  %1459 = vmatprep.subr.mxu1 %v3130_v59  ;;  %v1488_v33 = vmul.f32 %v3140_v16, %v3140_v16 }
  0xae   : > { %1356 = vmatprep.subr.mxu0 %v3129_v17  ;;  %1362 = vmatprep.mubr.f32.mxu0 %v3133_v56  ;;  %v1514_v17 = vld [vmem:[%s1760_s8] sm:$0x3] }
  0xaf   : > { %1360 = vmatpush2.msra.mxu0 %v3132_v23  ;;  %1461 = vmatpush2.msra.mxu1 %v3134_v21  ;;  %v1506_v23 = vrot.slane %v3139_v28, 7 }
  0xb0   : > { %1364 = vmatmul.mubr.f32.vlgmr.msra.gmra.mxu0 %v3135_v9  ;;  %1463 = vmatprep.subr.mxu1 %v3136_v25 }
  0xb1   : > { %1479 = vmatprep.mubr.f32.mxu1 %v3133_v56  ;;  %1465 = vmatpush2.msra.mxu1 %v3137_v27  ;;  %v1491_v27 = vmul.f32 %v1488_v33, %v1488_v33 }
  0xb2   : > { %341 = vadd.xlane.f32.xlu0 %v340_v18  ;;  %1467 = vmatprep.subr.mxu1 %v3138_v42  ;;  %v1490_v18 = vmul.f32 %v1487_v11, %v1487_v11 }
  0xb3   : > { %1469 = vmatpush2.msra.mxu1 %v2343_v2  ;;  %v2769_v2 = vsub.s32 0, %v365_v22 }
  0xb4   : > { %1471 = vmatprep.subr.mxu1 %v3059_v63  ;;  %v2771_v63 = vsub.s32 1, %v365_v22  ;;  %v1507_v22 = vrot.slane %v3140_v16, 7 }
  0xb5   : > { %1473 = vmatpush2.msra.mxu1 %v3061_v15  ;;  %v362_v15 = vld [vmem:[%s1765_s11] sm:$0x3]  ;;  %v384_v8 = vrot.slane %v379_v58, %v2769_v2  ;;  %v1496_v35 = vrot.slane %v1489_v53, %v2769_v2  ;;  %v1519_v25 = vrot.slane %v1514_v17, %v2769_v2 }
  0xb6   : > { %1475 = vmatprep.subr.mxu1 %v3063_v50  ;;  %v367_v50 = vrot.slane %v362_v15, %v2769_v2  ;;  %v371_v45 = vrot.slane %v362_v15, %v2771_v63  ;;  %v388_v13 = vrot.slane %v379_v58, %v2771_v63  ;;  %v1500_v49 = vrot.slane %v1489_v53, %v2771_v63  ;;  %v333_v15 = vld [vmem:[#allocation3] sm:$0x1] }
  0xb7   : > { %1477 = vmatpush2.msra.mxu1 %v3065_v57 }
  0xb8   : > { %1481 = vmatmul.mubr.f32.vlgmr.msra.gmra.mxu1 %v3135_v9  ;;  %v374_v34 = vsub.f32 %v2765_v7, %v367_v50  ;;  %v375_v57 = vsub.f32 %v2767_v29, %v371_v45  ;;  %v1503_v45 = vmul.f32 %v1496_v35, %v1490_v18 }
  0xba   : > { %v377_v54 = vmul.f32 %v374_v34, %v374_v34  ;;  %v378_v20 = vmul.f32 %v375_v57, %v375_v57  ;;  %v1523_v34 = vrot.slane %v1514_v17, %v2771_v63  ;;  %v1510_v57 = vsub.f32 %v2765_v7, %v1506_v23 }
  0xbc   : > { %v391_v3 = vmul.f32 %v384_v8, %v377_v54  ;;  %v392_v55 = vmul.f32 %v388_v13, %v378_v20 }
  0xbe   : > { %v393_v61 = vsel %vm336_vm4, %v391_v3, 0.0  ;;  %v394_v38 = vsel %vm338_vm5, %v392_v55, 0.0  ;;  %v1504_v55 = vmul.f32 %v1500_v49, %v1491_v27 }
  0xbf   : > { %v395_v24 = vadd.f32 %v394_v38, %v393_v61  ;;  %v1511_v61 = vsub.f32 %v2767_v29, %v1507_v22  ;;  %v376_v29 = vld [vmem:[#allocation4] sm:$0x1] }
  0xc1   : > { %396 = vadd.xlane.f32.xlu0 %v395_v24  ;;  %v1513_v7 = vmul.f32 0.16875, %v1511_v61 }
 0x117   : > { %v583_v4 = vpop.f32.mrf.mxu0 }
 0x119   : > { %v585_v5 = vpop.f32.mrf.mxu0 }
 0x11b   : > { %v876_v6 = vpop.f32.mrf.mxu1 }
 0x11c   : > { %v877_v12 = vadd.f32 %v876_v6, %v583_v4 }
 0x11d   : > { %v878_v10 = vpop.f32.mrf.mxu1 }
 0x11e   : > { %v879_v39 = vadd.f32 %v878_v10, %v585_v5 }
 0x13b   : > { %v342_v26 = vpop.xlane.xlu0 %341 }
 0x13c   : > { %v343_v40 = vrot.slane %v342_v26, 4 }
 0x13e   : > { %v344_v0 = vadd.f32 %v343_v40, %v342_v26  ;;  %v1512_v26 = vmul.f32 0.16875, %v1510_v57 }
 0x140   : > { %v345_v32 = vrot.slane %v344_v0, 2 }
 0x142   : > { %v346_v19 = vadd.f32 %v345_v32, %v344_v0 }
 0x143   : > { %v1039_v62 = vpop.f32.mrf.mxu0 }
 0x144   : > { %v347_v37 = vrot.slane %v346_v19, 1  ;;  %v1040_v44 = vadd.f32 %v1039_v62, %v877_v12 }
 0x145   : > { %v1041_v48 = vpop.f32.mrf.mxu0 }
 0x146   : > { %v348_v36 = vadd.f32 %v347_v37, %v346_v19  ;;  %v1042_v56 = vadd.f32 %v1041_v48, %v879_v39 }
 0x148   : > { %1677 = vpush %v348_v36 }
 0x14a   : > { %v397_v41 = vpop.xlane.xlu0 %396  ;;  %v1160_v47 = vpop.f32.mrf.mxu1 }
 0x14b   : > { %v398_v51 = vrot.slane %v397_v41, 4  ;;  %v1161_v21 = vadd.f32 %v1160_v47, %v1040_v44 }
 0x14c   : > { %v1162_v59 = vpop.f32.mrf.mxu1 }
 0x14d   : > { %v399_v46 = vadd.f32 %v398_v51, %v397_v41  ;;  %v1163_v42 = vadd.f32 %v1162_v59, %v1042_v56 }
 0x14f   : > { %v400_v14 = vrot.slane %v399_v46, 2 }
 0x151   : > { %v401_v60 = vadd.f32 %v400_v14, %v399_v46 }
 0x153   : > { %v402_v1 = vrot.slane %v401_v60, 1 }
 0x155   : > { %v403_v30 = vadd.f32 %v402_v1, %v401_v60  ;;  %v1538_v1 = vld [vmem:[#allocation2] sm:$0x1f] }
 0x157   : > { %1679 = vpush %v403_v30 }
 0x170   : > { %v1365_v52 = vpop.f32.mrf.mxu0 }
 0x171   : > { %v1366_v43 = vadd.f32 %v1365_v52, %v1161_v21 }
 0x172   : > { %v1367_v9 = vpop.f32.mrf.mxu0 }
 0x173   : > { %v1368_v58 = vadd.f32 %v1367_v9, %v1163_v42 }
 0x178   : > { %v1482_v50 = vpop.f32.mrf.mxu1 }
 0x179   : > { %s1678_s8 = spop %1677  ;;  %v1483_v54 = vadd.f32 %v1482_v50, %v1366_v43 }
 0x17a   : > { %v350_v20 = vstv %s1678_s8  ;;  %v1484_v2 = vpop.f32.mrf.mxu1 }
 0x17b   : > { %v351_v8 = vadd.f32 %v350_v20, %v333_v15  ;;  %v1526_v13 = vsub.f32 %v1519_v25, %v1483_v54  ;;  %v1485_v3 = vadd.f32 %v1484_v2, %v1368_v58 }
 0x17d   : > { %353 = vst.msk [vmem:[#allocation3] sm:$0x1] %vm352_vm6, %v351_v8  ;;  %v1528_v38 = vsub.f32 %v1526_v13, %v1503_v45  ;;  %v1527_v24 = vsub.f32 %v1523_v34, %v1485_v3 }
 0x17f   : > { %v1532_v63 = vrot.slane %v1528_v38, 7  ;;  %v1529_v40 = vsub.f32 %v1527_v24, %v1504_v55 }
 0x181   : > { %v1533_v0 = vrot.slane %v1529_v40, 7  ;;  %v1536_v32 = vsub.f32 %v1512_v26, %v1532_v63 }
 0x183   : > { %v1537_v19 = vsub.f32 %v1513_v7, %v1533_v0  ;;  %v1539_v37 = vand.u32 2147483647, %v1536_v32 }
 0x185   : > { %v1540_v36 = vand.u32 2147483647, %v1537_v19  ;;  %v1542_v41 = vsel %vm1541_vm7, %v1539_v37, 0.0 }
 0x187   : > { %v1544_v51 = vsel %vm1543_vm8, %v1540_v36, 0.0 }
 0x188   : > { %v1545_v46 = vadd.f32 %v1544_v51, %v1542_v41  ;;  %s1680_s22 = spop %1679 }
 0x189   : > { %v405_v14 = vstv %s1680_s22 }
 0x18a   : > { %1546 = vadd.xlane.f32.xlu1 %v1545_v46  ;;  %v406_v60 = vadd.f32 %v405_v14, %v376_v29 }
 0x18c   : > { %407 = vst.msk [vmem:[#allocation4] sm:$0x1] %vm352_vm6, %v406_v60 }
 0x213   : > { %v1547_v30 = vpop.xlane.xlu1 %1546 }
 0x214   : > { %v1549_v4 = vrot.slane %v1547_v30, 1  ;;  %1557 = sbr.rel (%p1672_p5) target bundleno = 758 (0x2f6), region = 56 }
 0x216   : > { %v1551_v5 = vadd.f32 %v1549_v4, %v1538_v1 }
 0x218   : > { %1553 = vst.msk [vmem:[#allocation2] sm:$0x1f] %vm1552_vm9, %v1551_v5 }
 0x219   : > { %v1558_v47 = vld [vmem:[#allocation3] sm:$0x1]  ;;  %v1562_v28 = vld [vmem:[#allocation4] sm:$0x1]  ;;  %v1583_v44 = vand.u32 127, %v364_v31 }
 0x21a   : > { %1681 = vpush %v1558_v47 }
 0x21b   : > { %1683 = vpush %v1562_v28  ;;  %vm1587_vm10 = vcmp.eq.s32.totalorder %v1583_v44, 3  ;;  %vm1586_vm11 = vcmp.eq.s32.totalorder %v1583_v44, 2  ;;  %vm1585_vm12 = vcmp.eq.s32.totalorder %v1583_v44, 1  ;;  %vm1584_vm13 = vcmp.eq.s32.totalorder %v1583_v44, 0 }
 0x21f   : > { %v1566_v6 = vld [vmem:[#allocation2] sm:$0x1f] }
 0x220   : > { %v1567_v62 = vmul.f32 0.00295858, %v1566_v6 }
 0x222   : > { %v1568_v10 = vmul.f32 %v1567_v62, %v1567_v62 }
 0x224   : > { %v1569_v48 = vsel %vm1552_vm9, %v1568_v10, 0.0 }
 0x225   : > { %1570 = vadd.xlane.f32.xlu0 %v1569_v48 }
 0x24b   : > { %s1682_s23 = spop %1681 }
 0x24c   : > { %s1684_s25 = spop %1683  ;;  %s1561_s27 = smul.f32 0.00049309665, %s1682_s23 }
 0x24d   : > { %s1565_s26 = smul.f32 0.020833334, %s1684_s25 }
 0x24e   : > { %v1592_v35 = vstv %s1561_s27 }
 0x24f   : > { %v1588_v17 = vstv %s1565_s26 }
 0x250   : > { %v1589_v59 = vsel %vm1587_vm10, %v1588_v17, 0.0 }
 0x2ae   : > { %v1571_v11 = vpop.xlane.xlu0 %1570 }
 0x2af   : > { %v1572_v12 = vrot.slane %v1571_v11, 4 }
 0x2b1   : > { %v1573_v53 = vadd.f32 %v1572_v12, %v1571_v11 }
 0x2b3   : > { %v1574_v52 = vrot.slane %v1573_v53, 2 }
 0x2b5   : > { %v1575_v16 = vadd.f32 %v1574_v52, %v1573_v53 }
 0x2b7   : > { %v1576_v33 = vrot.slane %v1575_v16, 1 }
 0x2b9   : > { %v1577_v39 = vadd.f32 %v1576_v33, %v1575_v16 }
 0x2bb   : > { %1685 = vpush %v1577_v39 }
 0x2ec   : > { %s1686_s28 = spop %1685 }
 0x2ed   : > { %s1579_s29 = smul.f32 0.2, %s1686_s28 }
 0x2ef   : > { %s1580_s30 = sadd.f32 %s1579_s29, %s1561_s27  ;;  %v1590_v18 = vstv %s1579_s29 }
 0x2f0   : > { %v1591_v23 = vsel %vm1586_vm11, %v1590_v18, %v1589_v59 }
 0x2f1   : > { %s1581_s9 = sadd.f32 %s1580_s30, %s1565_s26  ;;  %v1593_v56 = vsel %vm1585_vm12, %v1592_v35, %v1591_v23 }
 0x2f3   : > { %v1594_v21 = vstv %s1581_s9 }
 0x2f4   : > { %v1595_v9 = vsel %vm1584_vm13, %v1594_v21, %v1593_v56 }
 0x2f5   : > { %1596 = vst [vmem:[%s2818_s7] sm:$0x1] %v1595_v9 }
 0x2f6 PF: > { %s17_s24 = sadd.s32 1, %s1702_s24  }
 0x2f7   : > { %p14_p6 = scmp.ge.s32.totalorder %s17_s24, 4  }
 0x2f9   :  { %16 = sbr.rel (!%p14_p6) target bundleno = 1 (0x1), region = 91 }

</bundles_post_ra>
